<compile_context>
chip_gen: v5e
topology: v5e:2x2
jax: 0.10.0
libtpu: 0.0.40
codegen_flags: <defaults>
</compile_context>

<pallas_src>
import math
from functools import partial

import jax
import jax.numpy as jnp
from jax.experimental import pallas as pl
from jax.experimental.pallas import tpu as pltpu


# ----------------------------------------------------------------------------
# Static per-conv plan (mirrors TemporalEncoder.__init__)
# ----------------------------------------------------------------------------
def _build_plan(shape, traj_length, output_size):
    n_subnets = int(math.log2(shape))
    assert 2 ** n_subnets == shape, "shape must be a power of two"
    assert traj_length >= 2
    T = traj_length
    hidden = 8
    assert output_size >= hidden * 2 ** (n_subnets - 1)

    dims = [(1, hidden)]
    h = hidden
    for sn in range(1, n_subnets):
        dims.append((h, h * 2) if sn < n_subnets - 1 else (h, output_size))
        h *= 2

    plan = []
    hin, win = shape, T
    for sn, (cin, cout) in enumerate(dims):
        last = sn == n_subnets - 1
        # ar subnet: Conv2d(k=[3, T-1], stride=1, pad=[1, T-1]) + BN + LeakyReLU(0.2)
        kw, pw = T - 1, T - 1
        oh, ow = hin, win + 2 * pw - kw + 1
        plan.append(dict(cin=cin, hin=hin, win=win, cout=cout, oh=oh, ow=ow,
                         kh=3, kw=kw, ph=1, pw=pw, sh=1, slope=0.2))
        hin, win = oh, ow
        # spa subnet: Conv2d(k=[3,1], stride=[2,1], pad=[1,0]) (+ BN + LeakyReLU,
        # except the last stage which is conv-only)
        oh, ow = (hin + 2 - 3) // 2 + 1, win
        plan.append(dict(cin=cout, hin=hin, win=win, cout=cout, oh=oh, ow=ow,
                         kh=3, kw=1, ph=1, pw=0, sh=2,
                         slope=None if last else 0.2))
        hin, win = oh, ow

    # chained-shape sanity
    for a, b in zip(plan[:-1], plan[1:]):
        assert a["cout"] * a["oh"] == b["cin"] * b["hin"]
        assert a["ow"] == b["win"]
    assert plan[-1]["oh"] == 1
    return plan


# ----------------------------------------------------------------------------
# Deterministic parameter construction (PyTorch-style shapes/init)
# ----------------------------------------------------------------------------
def init_params(key, shape, traj_length, output_size):
    plan = _build_plan(shape, traj_length, output_size)
    bn_eps = 1e-5
    params = []
    for cfg in plan:
        cin, cout, kh, kw = cfg["cin"], cfg["cout"], cfg["kh"], cfg["kw"]
        key, k1, k2, k3, k4 = jax.random.split(key, 5)
        bound = 1.0 / math.sqrt(cin * kh * kw)
        w = jax.random.uniform(k1, (cout, cin, kh, kw), jnp.float32, -bound, bound)
        b = jax.random.uniform(k2, (cout,), jnp.float32, -bound, bound)
        if cfg["slope"] is not None:                 # conv + BN + LeakyReLU
            gamma = 1.0 + 0.1 * jax.random.normal(k3, (cout,), jnp.float32)
            beta = 0.1 * jax.random.normal(k4, (cout,), jnp.float32)
            scale = gamma / math.sqrt(1.0 + bn_eps)  # eval BN: mean=0, var=1
            shift = beta + scale * b
        else:                                        # last spa conv: bias only
            scale = jnp.ones((cout,), jnp.float32)
            shift = b
        params.append(dict(w=w, scale=scale, shift=shift))
    return params


# ----------------------------------------------------------------------------
# Host-side folding: conv taps -> dense matrices the kernel can MXU-multiply
# ----------------------------------------------------------------------------
def _fold_conv_weights(w, cfg):
    """Fold H-axis taps, H stride and H padding into a dense matrix.
    Returns (KW*Cout*OH, Cin*Hin): row order (dx, co, oh), col order (ci, h)."""
    cout, cin, kh, kw = w.shape
    hin, oh, ph, sh = cfg["hin"], cfg["oh"], cfg["ph"], cfg["sh"]
    dy = jnp.arange(kh)[:, None, None]
    h = jnp.arange(hin)[None, :, None]
    o = jnp.arange(oh)[None, None, :]
    sel = (sh * o + dy - ph == h).astype(w.dtype)     # (KH, Hin, OH)
    m = jnp.einsum("oidx,dhp->xopih", w, sel)         # (KW, Cout, OH, Cin, Hin)
    return m.reshape(kw * cout * oh, cin * hin)


def _build_gather_mats(cfg, n_batch):
    """0/1 matrices G[dx] of shape (N*Win, N*OW): right-multiplying the
    activation canvas (rows = Cin*Hin, cols = (n, w)) by G[dx] applies the
    W-axis tap dx including per-sample zero padding (no jnp.pad / reshapes)."""
    win, ow, kw, pw = cfg["win"], cfg["ow"], cfg["kw"], cfg["pw"]
    src = jnp.arange(win)
    dst = jnp.arange(ow)
    eye_n = jnp.eye(n_batch, dtype=jnp.float32)
    gs = []
    for dx in range(kw):
        w_in = dst + dx - pw                                # may be out of range
        g_small = (src[:, None] == w_in[None, :]).astype(jnp.float32)  # (Win, OW)
        gs.append(jnp.kron(eye_n, g_small))                 # block-diag over n
    return jnp.stack(gs, axis=0)                            # (KW, N*Win, N*OW)


def _needs_g(cfg):
    return cfg["kw"] > 1 or cfg["pw"] > 0


# ----------------------------------------------------------------------------
# The fused Pallas kernel: the whole forward pass in one invocation
# ----------------------------------------------------------------------------
def _make_fused_kernel(plan, n_batch):
    def kernel(*refs):
        x_ref, o_ref = refs[0], refs[-1]
        p_refs = refs[1:-1]

        # activation canvas: rows = Cin*H, lanes = (n, w); starts as (K, N*T)
        act = x_ref[...]

        cur = 0
        for cfg in plan:
            wstack = p_refs[cur][...]        # (KW*Cout*OH, Cin*Hin)
            scale = p_refs[cur + 1][...]     # (Cout*OH, 1)
            shift = p_refs[cur + 2][...]     # (Cout*OH, 1)
            cur += 3
            kw = cfg["kw"]
            pout = cfg["cout"] * cfg["oh"]

            # channel+height contraction (taps/stride/pad folded in): one dot
            pall = jnp.dot(wstack, act, preferred_element_type=jnp.float32)

            if _needs_g(cfg):
                # W-axis taps + per-sample zero padding: one tiny 0/1 matmul
                # per tap on the otherwise idle MXU (no reshapes / pads).
                g = p_refs[cur][...]         # (KW, N*Win, N*OW)
                cur += 1
                y = None
                for dx in range(kw):
                    t = jnp.dot(pall[dx * pout:(dx + 1) * pout, :], g[dx],
                                preferred_element_type=jnp.float32)
                    y = t if y is None else y + t
            else:
                # spa conv: kernel width 1, no W padding -> columns unchanged
                y = pall

            y = y * scale + shift            # folded eval-mode BN + conv bias
            if cfg["slope"] is not None:
                y = jnp.where(y >= 0.0, y, cfg["slope"] * y)   # LeakyReLU(0.2)
            act = y                          # (Cout*OH, N*OW)

        # final activation is (Cout, N*Wf) (OH == 1); emit (N*Cout, Wf) so the
        # wrapper reshape to (N, Cout, Wf) is a free, metadata-only op.
        wf = plan[-1]["ow"]
        o_ref[...] = jnp.concatenate(
            [act[:, n * wf:(n + 1) * wf] for n in range(n_batch)], axis=0)

    return kernel


# ----------------------------------------------------------------------------
# Forward pass (mirrors TemporalEncoder.forward with skip_connections=False)
# ----------------------------------------------------------------------------
def _zero_index_map(ndim):
    return lambda i: (0,) * ndim


@partial(jax.jit, static_argnums=(2, 3, 4))
def temporal_encoder_forward(x, params, shape, traj_length, output_size):
    plan = _build_plan(shape, traj_length, output_size)
    B, C, K, T = x.shape
    assert K == shape and T == traj_length
    N = B * C

    # x.view(B*C, 1, K, T)  ->  activation canvas (Cin*H, N*W) = (K, N*T)
    x_c = jnp.transpose(x.reshape(N, K, T), (1, 0, 2)).reshape(K, N * T)

    inputs = [x_c]
    for cfg, p in zip(plan, params):
        inputs.append(_fold_conv_weights(p["w"], cfg))
        inputs.append(jnp.repeat(p["scale"].astype(jnp.float32), cfg["oh"])[:, None])
        inputs.append(jnp.repeat(p["shift"].astype(jnp.float32), cfg["oh"])[:, None])
        if _needs_g(cfg):
            inputs.append(_build_gather_mats(cfg, N))

    cout_f, wf = plan[-1]["cout"], plan[-1]["ow"]
    in_specs = [pl.BlockSpec(a.shape, _zero_index_map(a.ndim)) for a in inputs]

    out2d = pl.pallas_call(
        _make_fused_kernel(plan, N),
        out_shape=jax.ShapeDtypeStruct((N * cout_f, wf), jnp.float32),
        grid=(1,),                                   # whole batch in ONE step
        in_specs=in_specs,
        out_specs=pl.BlockSpec((N * cout_f, wf), lambda i: (0, 0)),
        compiler_params=pltpu.CompilerParams(dimension_semantics=("arbitrary",)),
    )(*inputs)

    return out2d.reshape(N, cout_f, wf)              # == PyTorch x.squeeze()


# ----------------------------------------------------------------------------
if __name__ == "__main__":
    key = jax.random.PRNGKey(0)
    shape_K = 8          # spatial "shape" -> n_subnets = log2(8) = 3
    traj_length = 4      # T
    output_size = 32     # >= 8 * 2**(n_subnets - 1) = 32
    B, C = 2, 2

    k_params, k_x = jax.random.split(key)
    params = init_params(k_params, shape_K, traj_length, output_size)
    x = jax.random.normal(k_x, (B, C, shape_K, traj_length), dtype=jnp.float32)

    out = temporal_encoder_forward(x, params, shape_K, traj_length, output_size)
    out = jax.block_until_ready(out)

    n_subnets = int(math.log2(shape_K))
    expected_width = traj_length * (n_subnets + 1)   # each ar conv adds T cols
    assert out.shape == (B * C, output_size, expected_width), out.shape
    assert bool(jnp.all(jnp.isfinite(out)))
    print("KERNEL_OK")
</pallas_src>

<mosaic_0001>
module attributes {stable_mosaic.version = 11 : i64} {
  func.func @kernel(%arg0: i32, %arg1: memref<8x16xf32, #tpu.memory_space<vmem>>, %arg2: memref<192x8xf32, #tpu.memory_space<vmem>>, %arg3: memref<64x1xf32, #tpu.memory_space<vmem>>, %arg4: memref<64x1xf32, #tpu.memory_space<vmem>>, %arg5: memref<3x16x32xf32, #tpu.memory_space<vmem>>, %arg6: memref<32x64xf32, #tpu.memory_space<vmem>>, %arg7: memref<32x1xf32, #tpu.memory_space<vmem>>, %arg8: memref<32x1xf32, #tpu.memory_space<vmem>>, %arg9: memref<192x32xf32, #tpu.memory_space<vmem>>, %arg10: memref<64x1xf32, #tpu.memory_space<vmem>>, %arg11: memref<64x1xf32, #tpu.memory_space<vmem>>, %arg12: memref<3x32x48xf32, #tpu.memory_space<vmem>>, %arg13: memref<32x64xf32, #tpu.memory_space<vmem>>, %arg14: memref<32x1xf32, #tpu.memory_space<vmem>>, %arg15: memref<32x1xf32, #tpu.memory_space<vmem>>, %arg16: memref<192x32xf32, #tpu.memory_space<vmem>>, %arg17: memref<64x1xf32, #tpu.memory_space<vmem>>, %arg18: memref<64x1xf32, #tpu.memory_space<vmem>>, %arg19: memref<3x48x64xf32, #tpu.memory_space<vmem>>, %arg20: memref<32x64xf32, #tpu.memory_space<vmem>>, %arg21: memref<32x1xf32, #tpu.memory_space<vmem>>, %arg22: memref<32x1xf32, #tpu.memory_space<vmem>>, %arg23: memref<128x16xf32, #tpu.memory_space<vmem>>) attributes {dimension_semantics = [#tpu.dimension_semantics<arbitrary>], iteration_bounds = array<i64: 1>, scalar_prefetch = 0 : i64, scratch_operands = 0 : i64, tpu.core_type = #tpu.core_type<tc>, window_params = [{pipeline_mode = #tpu.pipeline_mode<synchronous>, transform_indices = @transform_0, window_bounds = array<i64: 8, 16>}, {pipeline_mode = #tpu.pipeline_mode<synchronous>, transform_indices = @transform_1, window_bounds = array<i64: 192, 8>}, {pipeline_mode = #tpu.pipeline_mode<synchronous>, transform_indices = @transform_2, window_bounds = array<i64: 64, 1>}, {pipeline_mode = #tpu.pipeline_mode<synchronous>, transform_indices = @transform_3, window_bounds = array<i64: 64, 1>}, {pipeline_mode = #tpu.pipeline_mode<synchronous>, transform_indices = @transform_4, window_bounds = array<i64: 3, 16, 32>}, {pipeline_mode = #tpu.pipeline_mode<synchronous>, transform_indices = @transform_5, window_bounds = array<i64: 32, 64>}, {pipeline_mode = #tpu.pipeline_mode<synchronous>, transform_indices = @transform_6, window_bounds = array<i64: 32, 1>}, {pipeline_mode = #tpu.pipeline_mode<synchronous>, transform_indices = @transform_7, window_bounds = array<i64: 32, 1>}, {pipeline_mode = #tpu.pipeline_mode<synchronous>, transform_indices = @transform_8, window_bounds = array<i64: 192, 32>}, {pipeline_mode = #tpu.pipeline_mode<synchronous>, transform_indices = @transform_9, window_bounds = array<i64: 64, 1>}, {pipeline_mode = #tpu.pipeline_mode<synchronous>, transform_indices = @transform_10, window_bounds = array<i64: 64, 1>}, {pipeline_mode = #tpu.pipeline_mode<synchronous>, transform_indices = @transform_11, window_bounds = array<i64: 3, 32, 48>}, {pipeline_mode = #tpu.pipeline_mode<synchronous>, transform_indices = @transform_12, window_bounds = array<i64: 32, 64>}, {pipeline_mode = #tpu.pipeline_mode<synchronous>, transform_indices = @transform_13, window_bounds = array<i64: 32, 1>}, {pipeline_mode = #tpu.pipeline_mode<synchronous>, transform_indices = @transform_14, window_bounds = array<i64: 32, 1>}, {pipeline_mode = #tpu.pipeline_mode<synchronous>, transform_indices = @transform_15, window_bounds = array<i64: 192, 32>}, {pipeline_mode = #tpu.pipeline_mode<synchronous>, transform_indices = @transform_16, window_bounds = array<i64: 64, 1>}, {pipeline_mode = #tpu.pipeline_mode<synchronous>, transform_indices = @transform_17, window_bounds = array<i64: 64, 1>}, {pipeline_mode = #tpu.pipeline_mode<synchronous>, transform_indices = @transform_18, window_bounds = array<i64: 3, 48, 64>}, {pipeline_mode = #tpu.pipeline_mode<synchronous>, transform_indices = @transform_19, window_bounds = array<i64: 32, 64>}, {pipeline_mode = #tpu.pipeline_mode<synchronous>, transform_indices = @transform_20, window_bounds = array<i64: 32, 1>}, {pipeline_mode = #tpu.pipeline_mode<synchronous>, transform_indices = @transform_21, window_bounds = array<i64: 32, 1>}, {pipeline_mode = #tpu.pipeline_mode<synchronous>, transform_indices = @transform_22, window_bounds = array<i64: 128, 16>}]} {
    %c0 = arith.constant 0 : index
    %c0_0 = arith.constant 0 : index
    %0 = vector.load %arg1[%c0, %c0_0] : memref<8x16xf32, #tpu.memory_space<vmem>>, vector<8x16xf32>
    %c0_1 = arith.constant 0 : index
    %c0_2 = arith.constant 0 : index
    %1 = vector.load %arg2[%c0_1, %c0_2] : memref<192x8xf32, #tpu.memory_space<vmem>>, vector<192x8xf32>
    %c0_3 = arith.constant 0 : index
    %c0_4 = arith.constant 0 : index
    %2 = vector.load %arg3[%c0_3, %c0_4] : memref<64x1xf32, #tpu.memory_space<vmem>>, vector<64x1xf32>
    %c0_5 = arith.constant 0 : index
    %c0_6 = arith.constant 0 : index
    %3 = vector.load %arg4[%c0_5, %c0_6] : memref<64x1xf32, #tpu.memory_space<vmem>>, vector<64x1xf32>
    %cst = arith.constant dense<0.000000e+00> : vector<192x16xf32>
    %4 = tpu.matmul %1, %0, %cst {dimension_numbers = #tpu.dot_dimension_numbers<[1], [0], [0], [1], [0, 0, 1, 1], [], []>} : vector<192x8xf32>, vector<8x16xf32>, vector<192x16xf32> -> vector<192x16xf32>
    %c0_7 = arith.constant 0 : index
    %c0_8 = arith.constant 0 : index
    %c0_9 = arith.constant 0 : index
    %5 = vector.load %arg5[%c0_7, %c0_8, %c0_9] : memref<3x16x32xf32, #tpu.memory_space<vmem>>, vector<3x16x32xf32>
    %6 = vector.extract_strided_slice %4 {offsets = [0, 0], sizes = [64, 16], strides = [1, 1]} : vector<192x16xf32> to vector<64x16xf32>
    %7 = vector.extract_strided_slice %5 {offsets = [0, 0, 0], sizes = [1, 16, 32], strides = [1, 1, 1]} : vector<3x16x32xf32> to vector<1x16x32xf32>
    %8 = vector.shape_cast %7 : vector<1x16x32xf32> to vector<16x32xf32>
    %cst_10 = arith.constant dense<0.000000e+00> : vector<64x32xf32>
    %9 = tpu.matmul %6, %8, %cst_10 {dimension_numbers = #tpu.dot_dimension_numbers<[1], [0], [0], [1], [0, 0, 1, 1], [], []>} : vector<64x16xf32>, vector<16x32xf32>, vector<64x32xf32> -> vector<64x32xf32>
    %10 = vector.extract_strided_slice %4 {offsets = [64, 0], sizes = [64, 16], strides = [1, 1]} : vector<192x16xf32> to vector<64x16xf32>
    %11 = vector.extract_strided_slice %5 {offsets = [1, 0, 0], sizes = [1, 16, 32], strides = [1, 1, 1]} : vector<3x16x32xf32> to vector<1x16x32xf32>
    %12 = vector.shape_cast %11 : vector<1x16x32xf32> to vector<16x32xf32>
    %cst_11 = arith.constant dense<0.000000e+00> : vector<64x32xf32>
    %13 = tpu.matmul %10, %12, %cst_11 {dimension_numbers = #tpu.dot_dimension_numbers<[1], [0], [0], [1], [0, 0, 1, 1], [], []>} : vector<64x16xf32>, vector<16x32xf32>, vector<64x32xf32> -> vector<64x32xf32>
    %14 = arith.addf %9, %13 : vector<64x32xf32>
    %15 = vector.extract_strided_slice %4 {offsets = [128, 0], sizes = [64, 16], strides = [1, 1]} : vector<192x16xf32> to vector<64x16xf32>
    %16 = vector.extract_strided_slice %5 {offsets = [2, 0, 0], sizes = [1, 16, 32], strides = [1, 1, 1]} : vector<3x16x32xf32> to vector<1x16x32xf32>
    %17 = vector.shape_cast %16 : vector<1x16x32xf32> to vector<16x32xf32>
    %cst_12 = arith.constant dense<0.000000e+00> : vector<64x32xf32>
    %18 = tpu.matmul %15, %17, %cst_12 {dimension_numbers = #tpu.dot_dimension_numbers<[1], [0], [0], [1], [0, 0, 1, 1], [], []>} : vector<64x16xf32>, vector<16x32xf32>, vector<64x32xf32> -> vector<64x32xf32>
    %19 = arith.addf %14, %18 : vector<64x32xf32>
    %20 = vector.broadcast %2 : vector<64x1xf32> to vector<64x32xf32>
    %21 = arith.mulf %19, %20 : vector<64x32xf32>
    %22 = vector.broadcast %3 : vector<64x1xf32> to vector<64x32xf32>
    %23 = arith.addf %21, %22 : vector<64x32xf32>
    %cst_13 = arith.constant 0.000000e+00 : f32
    %24 = vector.broadcast %cst_13 : f32 to vector<64x32xf32>
    %25 = arith.cmpf oge, %23, %24 : vector<64x32xf32>
    %cst_14 = arith.constant 2.000000e-01 : f32
    %26 = vector.broadcast %cst_14 : f32 to vector<64x32xf32>
    %27 = arith.mulf %26, %23 : vector<64x32xf32>
    %28 = arith.select %25, %23, %27 : vector<64x32xi1>, vector<64x32xf32>
    %c0_15 = arith.constant 0 : index
    %c0_16 = arith.constant 0 : index
    %29 = vector.load %arg6[%c0_15, %c0_16] : memref<32x64xf32, #tpu.memory_space<vmem>>, vector<32x64xf32>
    %c0_17 = arith.constant 0 : index
    %c0_18 = arith.constant 0 : index
    %30 = vector.load %arg7[%c0_17, %c0_18] : memref<32x1xf32, #tpu.memory_space<vmem>>, vector<32x1xf32>
    %c0_19 = arith.constant 0 : index
    %c0_20 = arith.constant 0 : index
    %31 = vector.load %arg8[%c0_19, %c0_20] : memref<32x1xf32, #tpu.memory_space<vmem>>, vector<32x1xf32>
    %cst_21 = arith.constant dense<0.000000e+00> : vector<32x32xf32>
    %32 = tpu.matmul %29, %28, %cst_21 {dimension_numbers = #tpu.dot_dimension_numbers<[1], [0], [0], [1], [0, 0, 1, 1], [], []>} : vector<32x64xf32>, vector<64x32xf32>, vector<32x32xf32> -> vector<32x32xf32>
    %33 = vector.broadcast %30 : vector<32x1xf32> to vector<32x32xf32>
    %34 = arith.mulf %32, %33 : vector<32x32xf32>
    %35 = vector.broadcast %31 : vector<32x1xf32> to vector<32x32xf32>
    %36 = arith.addf %34, %35 : vector<32x32xf32>
    %cst_22 = arith.constant 0.000000e+00 : f32
    %37 = vector.broadcast %cst_22 : f32 to vector<32x32xf32>
    %38 = arith.cmpf oge, %36, %37 : vector<32x32xf32>
    %cst_23 = arith.constant 2.000000e-01 : f32
    %39 = vector.broadcast %cst_23 : f32 to vector<32x32xf32>
    %40 = arith.mulf %39, %36 : vector<32x32xf32>
    %41 = arith.select %38, %36, %40 : vector<32x32xi1>, vector<32x32xf32>
    %c0_24 = arith.constant 0 : index
    %c0_25 = arith.constant 0 : index
    %42 = vector.load %arg9[%c0_24, %c0_25] : memref<192x32xf32, #tpu.memory_space<vmem>>, vector<192x32xf32>
    %c0_26 = arith.constant 0 : index
    %c0_27 = arith.constant 0 : index
    %43 = vector.load %arg10[%c0_26, %c0_27] : memref<64x1xf32, #tpu.memory_space<vmem>>, vector<64x1xf32>
    %c0_28 = arith.constant 0 : index
    %c0_29 = arith.constant 0 : index
    %44 = vector.load %arg11[%c0_28, %c0_29] : memref<64x1xf32, #tpu.memory_space<vmem>>, vector<64x1xf32>
    %cst_30 = arith.constant dense<0.000000e+00> : vector<192x32xf32>
    %45 = tpu.matmul %42, %41, %cst_30 {dimension_numbers = #tpu.dot_dimension_numbers<[1], [0], [0], [1], [0, 0, 1, 1], [], []>} : vector<192x32xf32>, vector<32x32xf32>, vector<192x32xf32> -> vector<192x32xf32>
    %c0_31 = arith.constant 0 : index
    %c0_32 = arith.constant 0 : index
    %c0_33 = arith.constant 0 : index
    %46 = vector.load %arg12[%c0_31, %c0_32, %c0_33] : memref<3x32x48xf32, #tpu.memory_space<vmem>>, vector<3x32x48xf32>
    %47 = vector.extract_strided_slice %45 {offsets = [0, 0], sizes = [64, 32], strides = [1, 1]} : vector<192x32xf32> to vector<64x32xf32>
    %48 = vector.extract_strided_slice %46 {offsets = [0, 0, 0], sizes = [1, 32, 48], strides = [1, 1, 1]} : vector<3x32x48xf32> to vector<1x32x48xf32>
    %49 = vector.shape_cast %48 : vector<1x32x48xf32> to vector<32x48xf32>
    %cst_34 = arith.constant dense<0.000000e+00> : vector<64x48xf32>
    %50 = tpu.matmul %47, %49, %cst_34 {dimension_numbers = #tpu.dot_dimension_numbers<[1], [0], [0], [1], [0, 0, 1, 1], [], []>} : vector<64x32xf32>, vector<32x48xf32>, vector<64x48xf32> -> vector<64x48xf32>
    %51 = vector.extract_strided_slice %45 {offsets = [64, 0], sizes = [64, 32], strides = [1, 1]} : vector<192x32xf32> to vector<64x32xf32>
    %52 = vector.extract_strided_slice %46 {offsets = [1, 0, 0], sizes = [1, 32, 48], strides = [1, 1, 1]} : vector<3x32x48xf32> to vector<1x32x48xf32>
    %53 = vector.shape_cast %52 : vector<1x32x48xf32> to vector<32x48xf32>
    %cst_35 = arith.constant dense<0.000000e+00> : vector<64x48xf32>
    %54 = tpu.matmul %51, %53, %cst_35 {dimension_numbers = #tpu.dot_dimension_numbers<[1], [0], [0], [1], [0, 0, 1, 1], [], []>} : vector<64x32xf32>, vector<32x48xf32>, vector<64x48xf32> -> vector<64x48xf32>
    %55 = arith.addf %50, %54 : vector<64x48xf32>
    %56 = vector.extract_strided_slice %45 {offsets = [128, 0], sizes = [64, 32], strides = [1, 1]} : vector<192x32xf32> to vector<64x32xf32>
    %57 = vector.extract_strided_slice %46 {offsets = [2, 0, 0], sizes = [1, 32, 48], strides = [1, 1, 1]} : vector<3x32x48xf32> to vector<1x32x48xf32>
    %58 = vector.shape_cast %57 : vector<1x32x48xf32> to vector<32x48xf32>
    %cst_36 = arith.constant dense<0.000000e+00> : vector<64x48xf32>
    %59 = tpu.matmul %56, %58, %cst_36 {dimension_numbers = #tpu.dot_dimension_numbers<[1], [0], [0], [1], [0, 0, 1, 1], [], []>} : vector<64x32xf32>, vector<32x48xf32>, vector<64x48xf32> -> vector<64x48xf32>
    %60 = arith.addf %55, %59 : vector<64x48xf32>
    %61 = vector.broadcast %43 : vector<64x1xf32> to vector<64x48xf32>
    %62 = arith.mulf %60, %61 : vector<64x48xf32>
    %63 = vector.broadcast %44 : vector<64x1xf32> to vector<64x48xf32>
    %64 = arith.addf %62, %63 : vector<64x48xf32>
    %cst_37 = arith.constant 0.000000e+00 : f32
    %65 = vector.broadcast %cst_37 : f32 to vector<64x48xf32>
    %66 = arith.cmpf oge, %64, %65 : vector<64x48xf32>
    %cst_38 = arith.constant 2.000000e-01 : f32
    %67 = vector.broadcast %cst_38 : f32 to vector<64x48xf32>
    %68 = arith.mulf %67, %64 : vector<64x48xf32>
    %69 = arith.select %66, %64, %68 : vector<64x48xi1>, vector<64x48xf32>
    %c0_39 = arith.constant 0 : index
    %c0_40 = arith.constant 0 : index
    %70 = vector.load %arg13[%c0_39, %c0_40] : memref<32x64xf32, #tpu.memory_space<vmem>>, vector<32x64xf32>
    %c0_41 = arith.constant 0 : index
    %c0_42 = arith.constant 0 : index
    %71 = vector.load %arg14[%c0_41, %c0_42] : memref<32x1xf32, #tpu.memory_space<vmem>>, vector<32x1xf32>
    %c0_43 = arith.constant 0 : index
    %c0_44 = arith.constant 0 : index
    %72 = vector.load %arg15[%c0_43, %c0_44] : memref<32x1xf32, #tpu.memory_space<vmem>>, vector<32x1xf32>
    %cst_45 = arith.constant dense<0.000000e+00> : vector<32x48xf32>
    %73 = tpu.matmul %70, %69, %cst_45 {dimension_numbers = #tpu.dot_dimension_numbers<[1], [0], [0], [1], [0, 0, 1, 1], [], []>} : vector<32x64xf32>, vector<64x48xf32>, vector<32x48xf32> -> vector<32x48xf32>
    %74 = vector.broadcast %71 : vector<32x1xf32> to vector<32x48xf32>
    %75 = arith.mulf %73, %74 : vector<32x48xf32>
    %76 = vector.broadcast %72 : vector<32x1xf32> to vector<32x48xf32>
    %77 = arith.addf %75, %76 : vector<32x48xf32>
    %cst_46 = arith.constant 0.000000e+00 : f32
    %78 = vector.broadcast %cst_46 : f32 to vector<32x48xf32>
    %79 = arith.cmpf oge, %77, %78 : vector<32x48xf32>
    %cst_47 = arith.constant 2.000000e-01 : f32
    %80 = vector.broadcast %cst_47 : f32 to vector<32x48xf32>
    %81 = arith.mulf %80, %77 : vector<32x48xf32>
    %82 = arith.select %79, %77, %81 : vector<32x48xi1>, vector<32x48xf32>
    %c0_48 = arith.constant 0 : index
    %c0_49 = arith.constant 0 : index
    %83 = vector.load %arg16[%c0_48, %c0_49] : memref<192x32xf32, #tpu.memory_space<vmem>>, vector<192x32xf32>
    %c0_50 = arith.constant 0 : index
    %c0_51 = arith.constant 0 : index
    %84 = vector.load %arg17[%c0_50, %c0_51] : memref<64x1xf32, #tpu.memory_space<vmem>>, vector<64x1xf32>
    %c0_52 = arith.constant 0 : index
    %c0_53 = arith.constant 0 : index
    %85 = vector.load %arg18[%c0_52, %c0_53] : memref<64x1xf32, #tpu.memory_space<vmem>>, vector<64x1xf32>
    %cst_54 = arith.constant dense<0.000000e+00> : vector<192x48xf32>
    %86 = tpu.matmul %83, %82, %cst_54 {dimension_numbers = #tpu.dot_dimension_numbers<[1], [0], [0], [1], [0, 0, 1, 1], [], []>} : vector<192x32xf32>, vector<32x48xf32>, vector<192x48xf32> -> vector<192x48xf32>
    %c0_55 = arith.constant 0 : index
    %c0_56 = arith.constant 0 : index
    %c0_57 = arith.constant 0 : index
    %87 = vector.load %arg19[%c0_55, %c0_56, %c0_57] : memref<3x48x64xf32, #tpu.memory_space<vmem>>, vector<3x48x64xf32>
    %88 = vector.extract_strided_slice %86 {offsets = [0, 0], sizes = [64, 48], strides = [1, 1]} : vector<192x48xf32> to vector<64x48xf32>
    %89 = vector.extract_strided_slice %87 {offsets = [0, 0, 0], sizes = [1, 48, 64], strides = [1, 1, 1]} : vector<3x48x64xf32> to vector<1x48x64xf32>
    %90 = vector.shape_cast %89 : vector<1x48x64xf32> to vector<48x64xf32>
    %cst_58 = arith.constant dense<0.000000e+00> : vector<64x64xf32>
    %91 = tpu.matmul %88, %90, %cst_58 {dimension_numbers = #tpu.dot_dimension_numbers<[1], [0], [0], [1], [0, 0, 1, 1], [], []>} : vector<64x48xf32>, vector<48x64xf32>, vector<64x64xf32> -> vector<64x64xf32>
    %92 = vector.extract_strided_slice %86 {offsets = [64, 0], sizes = [64, 48], strides = [1, 1]} : vector<192x48xf32> to vector<64x48xf32>
    %93 = vector.extract_strided_slice %87 {offsets = [1, 0, 0], sizes = [1, 48, 64], strides = [1, 1, 1]} : vector<3x48x64xf32> to vector<1x48x64xf32>
    %94 = vector.shape_cast %93 : vector<1x48x64xf32> to vector<48x64xf32>
    %cst_59 = arith.constant dense<0.000000e+00> : vector<64x64xf32>
    %95 = tpu.matmul %92, %94, %cst_59 {dimension_numbers = #tpu.dot_dimension_numbers<[1], [0], [0], [1], [0, 0, 1, 1], [], []>} : vector<64x48xf32>, vector<48x64xf32>, vector<64x64xf32> -> vector<64x64xf32>
    %96 = arith.addf %91, %95 : vector<64x64xf32>
    %97 = vector.extract_strided_slice %86 {offsets = [128, 0], sizes = [64, 48], strides = [1, 1]} : vector<192x48xf32> to vector<64x48xf32>
    %98 = vector.extract_strided_slice %87 {offsets = [2, 0, 0], sizes = [1, 48, 64], strides = [1, 1, 1]} : vector<3x48x64xf32> to vector<1x48x64xf32>
    %99 = vector.shape_cast %98 : vector<1x48x64xf32> to vector<48x64xf32>
    %cst_60 = arith.constant dense<0.000000e+00> : vector<64x64xf32>
    %100 = tpu.matmul %97, %99, %cst_60 {dimension_numbers = #tpu.dot_dimension_numbers<[1], [0], [0], [1], [0, 0, 1, 1], [], []>} : vector<64x48xf32>, vector<48x64xf32>, vector<64x64xf32> -> vector<64x64xf32>
    %101 = arith.addf %96, %100 : vector<64x64xf32>
    %102 = vector.broadcast %84 : vector<64x1xf32> to vector<64x64xf32>
    %103 = arith.mulf %101, %102 : vector<64x64xf32>
    %104 = vector.broadcast %85 : vector<64x1xf32> to vector<64x64xf32>
    %105 = arith.addf %103, %104 : vector<64x64xf32>
    %cst_61 = arith.constant 0.000000e+00 : f32
    %106 = vector.broadcast %cst_61 : f32 to vector<64x64xf32>
    %107 = arith.cmpf oge, %105, %106 : vector<64x64xf32>
    %cst_62 = arith.constant 2.000000e-01 : f32
    %108 = vector.broadcast %cst_62 : f32 to vector<64x64xf32>
    %109 = arith.mulf %108, %105 : vector<64x64xf32>
    %110 = arith.select %107, %105, %109 : vector<64x64xi1>, vector<64x64xf32>
    %c0_63 = arith.constant 0 : index
    %c0_64 = arith.constant 0 : index
    %111 = vector.load %arg20[%c0_63, %c0_64] : memref<32x64xf32, #tpu.memory_space<vmem>>, vector<32x64xf32>
    %c0_65 = arith.constant 0 : index
    %c0_66 = arith.constant 0 : index
    %112 = vector.load %arg21[%c0_65, %c0_66] : memref<32x1xf32, #tpu.memory_space<vmem>>, vector<32x1xf32>
    %c0_67 = arith.constant 0 : index
    %c0_68 = arith.constant 0 : index
    %113 = vector.load %arg22[%c0_67, %c0_68] : memref<32x1xf32, #tpu.memory_space<vmem>>, vector<32x1xf32>
    %cst_69 = arith.constant dense<0.000000e+00> : vector<32x64xf32>
    %114 = tpu.matmul %111, %110, %cst_69 {dimension_numbers = #tpu.dot_dimension_numbers<[1], [0], [0], [1], [0, 0, 1, 1], [], []>} : vector<32x64xf32>, vector<64x64xf32>, vector<32x64xf32> -> vector<32x64xf32>
    %115 = vector.broadcast %112 : vector<32x1xf32> to vector<32x64xf32>
    %116 = arith.mulf %114, %115 : vector<32x64xf32>
    %117 = vector.broadcast %113 : vector<32x1xf32> to vector<32x64xf32>
    %118 = arith.addf %116, %117 : vector<32x64xf32>
    %119 = vector.extract_strided_slice %118 {offsets = [0, 0], sizes = [32, 16], strides = [1, 1]} : vector<32x64xf32> to vector<32x16xf32>
    %120 = vector.extract_strided_slice %118 {offsets = [0, 16], sizes = [32, 16], strides = [1, 1]} : vector<32x64xf32> to vector<32x16xf32>
    %121 = vector.extract_strided_slice %118 {offsets = [0, 32], sizes = [32, 16], strides = [1, 1]} : vector<32x64xf32> to vector<32x16xf32>
    %122 = vector.extract_strided_slice %118 {offsets = [0, 48], sizes = [32, 16], strides = [1, 1]} : vector<32x64xf32> to vector<32x16xf32>
    %123 = tpu.concatenate %119, %120, %121, %122 in 0 : vector<32x16xf32>, vector<32x16xf32>, vector<32x16xf32>, vector<32x16xf32> -> vector<128x16xf32>
    %c0_70 = arith.constant 0 : index
    %c0_71 = arith.constant 0 : index
    %124 = vector.load %arg23[%c0_70, %c0_71] : memref<128x16xf32, #tpu.memory_space<vmem>>, vector<128x16xf32>
    tpu.vector_store %arg23[%c0_70, %c0_71], %123 {strides = array<i32>} : memref<128x16xf32, #tpu.memory_space<vmem>>, vector<128x16xf32>,
    return
  }
  func.func @transform_0(%arg0: i32) -> (i32, i32) {
    %c0_i32 = arith.constant 0 : i32
    %c0_i32_0 = arith.constant 0 : i32
    %c0_i32_1 = arith.constant 0 : i32
    return %c0_i32, %c0_i32_0 : i32, i32
  }
  func.func @transform_1(%arg0: i32) -> (i32, i32) {
    %c0_i32 = arith.constant 0 : i32
    %c0_i32_0 = arith.constant 0 : i32
    %c0_i32_1 = arith.constant 0 : i32
    return %c0_i32, %c0_i32_0 : i32, i32
  }
  func.func @transform_2(%arg0: i32) -> (i32, i32) {
    %c0_i32 = arith.constant 0 : i32
    %c0_i32_0 = arith.constant 0 : i32
    %c0_i32_1 = arith.constant 0 : i32
    return %c0_i32, %c0_i32_0 : i32, i32
  }
  func.func @transform_3(%arg0: i32) -> (i32, i32) {
    %c0_i32 = arith.constant 0 : i32
    %c0_i32_0 = arith.constant 0 : i32
    %c0_i32_1 = arith.constant 0 : i32
    return %c0_i32, %c0_i32_0 : i32, i32
  }
  func.func @transform_4(%arg0: i32) -> (i32, i32, i32) {
    %c0_i32 = arith.constant 0 : i32
    %c0_i32_0 = arith.constant 0 : i32
    %c0_i32_1 = arith.constant 0 : i32
    %c0_i32_2 = arith.constant 0 : i32
    return %c0_i32, %c0_i32_0, %c0_i32_1 : i32, i32, i32
  }
  func.func @transform_5(%arg0: i32) -> (i32, i32) {
    %c0_i32 = arith.constant 0 : i32
    %c0_i32_0 = arith.constant 0 : i32
    %c0_i32_1 = arith.constant 0 : i32
    return %c0_i32, %c0_i32_0 : i32, i32
  }
  func.func @transform_6(%arg0: i32) -> (i32, i32) {
    %c0_i32 = arith.constant 0 : i32
    %c0_i32_0 = arith.constant 0 : i32
    %c0_i32_1 = arith.constant 0 : i32
    return %c0_i32, %c0_i32_0 : i32, i32
  }
  func.func @transform_7(%arg0: i32) -> (i32, i32) {
    %c0_i32 = arith.constant 0 : i32
    %c0_i32_0 = arith.constant 0 : i32
    %c0_i32_1 = arith.constant 0 : i32
    return %c0_i32, %c0_i32_0 : i32, i32
  }
  func.func @transform_8(%arg0: i32) -> (i32, i32) {
    %c0_i32 = arith.constant 0 : i32
    %c0_i32_0 = arith.constant 0 : i32
    %c0_i32_1 = arith.constant 0 : i32
    return %c0_i32, %c0_i32_0 : i32, i32
  }
  func.func @transform_9(%arg0: i32) -> (i32, i32) {
    %c0_i32 = arith.constant 0 : i32
    %c0_i32_0 = arith.constant 0 : i32
    %c0_i32_1 = arith.constant 0 : i32
    return %c0_i32, %c0_i32_0 : i32, i32
  }
  func.func @transform_10(%arg0: i32) -> (i32, i32) {
    %c0_i32 = arith.constant 0 : i32
    %c0_i32_0 = arith.constant 0 : i32
    %c0_i32_1 = arith.constant 0 : i32
    return %c0_i32, %c0_i32_0 : i32, i32
  }
  func.func @transform_11(%arg0: i32) -> (i32, i32, i32) {
    %c0_i32 = arith.constant 0 : i32
    %c0_i32_0 = arith.constant 0 : i32
    %c0_i32_1 = arith.constant 0 : i32
    %c0_i32_2 = arith.constant 0 : i32
    return %c0_i32, %c0_i32_0, %c0_i32_1 : i32, i32, i32
  }
  func.func @transform_12(%arg0: i32) -> (i32, i32) {
    %c0_i32 = arith.constant 0 : i32
    %c0_i32_0 = arith.constant 0 : i32
    %c0_i32_1 = arith.constant 0 : i32
    return %c0_i32, %c0_i32_0 : i32, i32
  }
  func.func @transform_13(%arg0: i32) -> (i32, i32) {
    %c0_i32 = arith.constant 0 : i32
    %c0_i32_0 = arith.constant 0 : i32
    %c0_i32_1 = arith.constant 0 : i32
    return %c0_i32, %c0_i32_0 : i32, i32
  }
  func.func @transform_14(%arg0: i32) -> (i32, i32) {
    %c0_i32 = arith.constant 0 : i32
    %c0_i32_0 = arith.constant 0 : i32
    %c0_i32_1 = arith.constant 0 : i32
    return %c0_i32, %c0_i32_0 : i32, i32
  }
  func.func @transform_15(%arg0: i32) -> (i32, i32) {
    %c0_i32 = arith.constant 0 : i32
    %c0_i32_0 = arith.constant 0 : i32
    %c0_i32_1 = arith.constant 0 : i32
    return %c0_i32, %c0_i32_0 : i32, i32
  }
  func.func @transform_16(%arg0: i32) -> (i32, i32) {
    %c0_i32 = arith.constant 0 : i32
    %c0_i32_0 = arith.constant 0 : i32
    %c0_i32_1 = arith.constant 0 : i32
    return %c0_i32, %c0_i32_0 : i32, i32
  }
  func.func @transform_17(%arg0: i32) -> (i32, i32) {
    %c0_i32 = arith.constant 0 : i32
    %c0_i32_0 = arith.constant 0 : i32
    %c0_i32_1 = arith.constant 0 : i32
    return %c0_i32, %c0_i32_0 : i32, i32
  }
  func.func @transform_18(%arg0: i32) -> (i32, i32, i32) {
    %c0_i32 = arith.constant 0 : i32
    %c0_i32_0 = arith.constant 0 : i32
    %c0_i32_1 = arith.constant 0 : i32
    %c0_i32_2 = arith.constant 0 : i32
    return %c0_i32, %c0_i32_0, %c0_i32_1 : i32, i32, i32
  }
  func.func @transform_19(%arg0: i32) -> (i32, i32) {
    %c0_i32 = arith.constant 0 : i32
    %c0_i32_0 = arith.constant 0 : i32
    %c0_i32_1 = arith.constant 0 : i32
    return %c0_i32, %c0_i32_0 : i32, i32
  }
  func.func @transform_20(%arg0: i32) -> (i32, i32) {
    %c0_i32 = arith.constant 0 : i32
    %c0_i32_0 = arith.constant 0 : i32
    %c0_i32_1 = arith.constant 0 : i32
    return %c0_i32, %c0_i32_0 : i32, i32
  }
  func.func @transform_21(%arg0: i32) -> (i32, i32) {
    %c0_i32 = arith.constant 0 : i32
    %c0_i32_0 = arith.constant 0 : i32
    %c0_i32_1 = arith.constant 0 : i32
    return %c0_i32, %c0_i32_0 : i32, i32
  }
  func.func @transform_22(%arg0: i32) -> (i32, i32) {
    %c0_i32 = arith.constant 0 : i32
    %c0_i32_0 = arith.constant 0 : i32
    %c0_i32_1 = arith.constant 0 : i32
    return %c0_i32, %c0_i32_0 : i32, i32
  }
}

</mosaic_0001>

<bundles_post_ra>
// kernel: temporal_encoder_forward.1
= control target key start
LH: loop header
LB: loop body
LE: loop exit
PB: predicated region body
PF: predicated region fallthrough
CT: control target
= control target key end

     0   :  { %vm112_vm0 = vcmask 64512   ;;  %v2246_v6 = vmov 0   ;;  %vm280_vm1 = vcmask 130048   ;;  %vm616_vm10 = vcmask 523264   ;;  %s3167_s0 = inlined_call_operand.vmem [shape: f32[8,16], index: 0, kind: input, shape index: {}]   ;;  %s3168_s1 = inlined_call_operand.vmem [shape: f32[192,8], index: 1, kind: input, shape index: {}]   ;;  %s3169_s2 = inlined_call_operand.vmem [shape: f32[64,1], index: 2, kind: input, shape index: {}]   ;;  %s3170_s3 = inlined_call_operand.vmem [shape: f32[64,1], index: 3, kind: input, shape index: {}]   ;;  %s3171_s6 = inlined_call_operand.vmem [shape: f32[32,1], index: 6, kind: input, shape index: {}]   ;;  %s3172_s7 = inlined_call_operand.vmem [shape: f32[32,1], index: 7, kind: input, shape index: {}]   ;;  %s3173_s9 = inlined_call_operand.vmem [shape: f32[64,1], index: 9, kind: input, shape index: {}]   ;;  %s3174_s4 = inlined_call_operand.vmem [shape: f32[3,16,32], index: 4, kind: input, shape index: {}]   ;;  %s3175_s10 = inlined_call_operand.vmem [shape: f32[64,1], index: 10, kind: input, shape index: {}]   ;;  %s3176_s13 = inlined_call_operand.vmem [shape: f32[32,1], index: 13, kind: input, shape index: {}]   ;;  %s3177_s14 = inlined_call_operand.vmem [shape: f32[32,1], index: 14, kind: input, shape index: {}]   ;;  %s3178_s16 = inlined_call_operand.vmem [shape: f32[64,1], index: 16, kind: input, shape index: {}]   ;;  %s3179_s17 = inlined_call_operand.vmem [shape: f32[64,1], index: 17, kind: input, shape index: {}]   ;;  %s3180_s20 = inlined_call_operand.vmem [shape: f32[32,1], index: 20, kind: input, shape index: {}]   ;;  %s3181_s21 = inlined_call_operand.vmem [shape: f32[32,1], index: 21, kind: input, shape index: {}]   ;;  %s3182_s5 = inlined_call_operand.vmem [shape: f32[32,64], index: 5, kind: input, shape index: {}]   ;;  %s3183_s8 = inlined_call_operand.vmem [shape: f32[192,32], index: 8, kind: input, shape index: {}]   ;;  %s3184_s11 = inlined_call_operand.vmem [shape: f32[3,32,48], index: 11, kind: input, shape index: {}]   ;;  %s3185_s12 = inlined_call_operand.vmem [shape: f32[32,64], index: 12, kind: input, shape index: {}]   ;;  %s3186_s15 = inlined_call_operand.vmem [shape: f32[192,32], index: 15, kind: input, shape index: {}]   ;;  %s3187_s18 = inlined_call_operand.vmem [shape: f32[3,48,64], index: 18, kind: input, shape index: {}]   ;;  %s3188_s19 = inlined_call_operand.vmem [shape: f32[32,64], index: 19, kind: input, shape index: {}]   ;;  %s3189_s22 = inlined_call_operand.vmem [shape: f32[128,16], index: 22, kind: output, shape index: {}]  }
   0x1   :  { %3196 = sst [smem:[#allocation2_spill]] %s3167_s0  ;;  %2243 = vset.pattern.permute.xlu0 %v2246_v6  ;;  %2244 = vset.pattern.permute.xlu1 %v2246_v6  ;;  %v275_v44 = vld [vmem:[%s3174_s4 + $0x8] sm:$0xff]  ;;  %v274_v49 = vld [vmem:[%s3174_s4] sm:$0xff]  ;;  %v756_v52 = vld [vmem:[%s3175_s10 + $0x30] sm:$0xff]  ;;  %vm758_vm15 = vcmask 261120  }
   0x2   :  { %3197 = sst [smem:[#allocation3_spill]] %s3168_s1  ;;  %2245 = vset.pattern.permute.xlu2 %v2246_v6  ;;  %v755_v53 = vld [vmem:[%s3175_s10 + $0x28] sm:$0xff]  ;;  %v757_v59 = vld [vmem:[%s3175_s10 + $0x38] sm:$0xff]  ;;  %v752_v61 = vld [vmem:[%s3175_s10 + $0x10] sm:$0xff] }
   0x3   :  { %3198 = sst [smem:[#allocation4_spill]] %s3169_s2  ;;  %v753_v60 = vld [vmem:[%s3175_s10 + $0x18] sm:$0xff] }
   0x4   :  { %3199 = sst [smem:[#allocation5_spill]] %s3170_s3 }
   0x5   :  { %3200 = sst [smem:[#allocation6_spill]] %s3171_s6 }
   0x6   :  { %3201 = sst [smem:[#allocation7_spill]] %s3172_s7 }
   0x7   :  { %3202 = sst [smem:[#allocation8_spill]] %s3173_s9 }
   0x8   :  { %s3203_s29 = sld [smem:[#allocation2_spill]] }
   0x9   :  { %s3204_s0 = sld [smem:[#allocation3_spill]] }
   0xa   :  { %s3205_s26 = sld [smem:[#allocation4_spill]] }
   0xb   :  { %s3206_s6 = sld [smem:[#allocation5_spill]] }
   0xc   :  { %s3208_s1 = sld [smem:[#allocation7_spill]] }
   0xd   :  { %s3209_s23 = sld [smem:[#allocation8_spill]] }
   0xe   :  { %v71_v0 = vld [vmem:[%s3203_s29] sm:$0xff]  ;;  %s3207_s29 = sld [smem:[#allocation6_spill]] }
   0xf   :  { %v72_v1 = vld [vmem:[%s3204_s0] sm:$0xff]  ;;  %200 = vmatpush.msra.mxu0 %v71_v0  ;;  %2229 = vmatpush.msra.mxu2 %v71_v0  ;;  %v73_v2 = vld [vmem:[%s3204_s0 + $0x8] sm:$0xff]  ;;  %v74_v3 = vld [vmem:[%s3204_s0 + $0x10] sm:$0xff] }
  0x10   :  { %2072 = vmatmul.msk.f32.vlgmr.msra.gmra.mxu0 %vm112_vm0, %v72_v1  ;;  %2230 = vmatpush.msra.mxu3 %v71_v0  ;;  %v103_v4 = vld [vmem:[%s3205_s26 + $0x38] sm:$0xff]  ;;  %v88_v5 = vld [vmem:[%s3204_s0 + $0x80] sm:$0xff]  ;;  %v102_v9 = vld [vmem:[%s3205_s26 + $0x30] sm:$0xff] }
  0x11   :  { %2228 = vmatpush.msra.mxu1 %v71_v0  ;;  %2088 = vmatmul.msk.f32.vlgmr.msra.gmra.mxu2 %vm112_vm0, %v88_v5  ;;  %v75_v7 = vld [vmem:[%s3204_s0 + $0x18] sm:$0xff]  ;;  %v89_v10 = vld [vmem:[%s3204_s0 + $0x88] sm:$0xff]  ;;  %v76_v11 = vld [vmem:[%s3204_s0 + $0x20] sm:$0xff] }
  0x12   :  { %521 = vperm.xlu0 %2243, %v103_v4   ;;  %v111_v8 = vld [vmem:[%s3206_s6 + $0x38] sm:$0xff]  ;;  %2089 = vmatmul.msk.f32.vlgmr.msra.gmra.mxu3 %vm112_vm0, %v89_v10  ;;  %v101_v12 = vld [vmem:[%s3205_s26 + $0x28] sm:$0xff]  ;;  %v90_v14 = vld [vmem:[%s3204_s0 + $0x90] sm:$0xff] }
  0x13   :  { %569 = vperm.xlu1 %2244, %v111_v8   ;;  %v109_v13 = vld [vmem:[%s3206_s6 + $0x28] sm:$0xff]  ;;  %v99_v16 = vld [vmem:[%s3205_s26 + $0x18] sm:$0xff]  ;;  %v98_v17 = vld [vmem:[%s3205_s26 + $0x10] sm:$0xff]  ;;  %384 = vmatpush.msrb.mxu2 %v275_v44 }
  0x14   :  { %v77_v15 = vld [vmem:[%s3204_s0 + $0x28] sm:$0xff]  ;;  %v91_v18 = vld [vmem:[%s3204_s0 + $0x98] sm:$0xff]  ;;  %v78_v19 = vld [vmem:[%s3204_s0 + $0x30] sm:$0xff] }
  0x15   :  { %v110_v20 = vld [vmem:[%s3206_s6 + $0x30] sm:$0xff]  ;;  %v107_v21 = vld [vmem:[%s3206_s6 + $0x18] sm:$0xff]  ;;  %v92_v23 = vld [vmem:[%s3204_s0 + $0xa0] sm:$0xff]  ;;  %385 = vmatpush.msrb.mxu2 %v274_v49 }
  0x16   :  { %v106_v22 = vld [vmem:[%s3206_s6 + $0x10] sm:$0xff]  ;;  %564 = vperm.xlu2 %2245, %v110_v20   ;;  %v79_v24 = vld [vmem:[%s3204_s0 + $0x38] sm:$0xff]  ;;  %v100_v25 = vld [vmem:[%s3205_s26 + $0x20] sm:$0xff] }
  0x17   :  { %v96_v26 = vld [vmem:[%s3205_s26] sm:$0xff]  ;;  %v93_v28 = vld [vmem:[%s3204_s0 + $0xa8] sm:$0xff]  ;;  %v611_v31 = vld [vmem:[%s3207_s29 + $0x18] sm:$0xff] }
  0x18   :  { %2073 = vmatmul.msk.f32.gmra.mxu0 %vm112_vm0, %v73_v2  ;;  %v104_v27 = vld [vmem:[%s3206_s6] sm:$0xff]  ;;  %v615_v32 = vld [vmem:[%s3208_s1 + $0x18] sm:$0xff]  ;;  %v94_v33 = vld [vmem:[%s3204_s0 + $0xb0] sm:$0xff] }
  0x19   :  { %v80_v29 = vld [vmem:[%s3204_s0 + $0x40] sm:$0xff]  ;;  %v81_v34 = vld [vmem:[%s3204_s0 + $0x48] sm:$0xff]  ;;  %v95_v38 = vld [vmem:[%s3204_s0 + $0xb8] sm:$0xff] }
  0x1a   :  { %516 = vperm.xlu0 %2243, %v102_v9   ;;  %2090 = vmatmul.msk.f32.gmra.mxu3 %vm112_vm0, %v90_v14  ;;  %v108_v30 = vld [vmem:[%s3206_s6 + $0x20] sm:$0xff]  ;;  %v97_v35 = vld [vmem:[%s3205_s26 + $0x8] sm:$0xff]  ;;  %v82_v39 = vld [vmem:[%s3204_s0 + $0x50] sm:$0xff] }
  0x1b   :  { %511 = vperm.xlu1 %2244, %v101_v12   ;;  %v609_v36 = vld [vmem:[%s3207_s29 + $0x8] sm:$0xff]  ;;  %v608_v37 = vld [vmem:[%s3207_s29] sm:$0xff]  ;;  %v749_v42 = vld [vmem:[%s3209_s23 + $0x38] sm:$0xff] }
  0x1c   :  { %v105_v40 = vld [vmem:[%s3206_s6 + $0x8] sm:$0xff]  ;;  %v87_v43 = vld [vmem:[%s3204_s0 + $0x78] sm:$0xff]  ;;  %v610_v46 = vld [vmem:[%s3207_s29 + $0x10] sm:$0xff] }
  0x1d   :  { %v613_v41 = vld [vmem:[%s3208_s1 + $0x8] sm:$0xff]  ;;  %2087 = vmatmul.msk.f32.vlgmr.msra.gmra.mxu1 %vm112_vm0, %v87_v43  ;;  %v83_v45 = vld [vmem:[%s3204_s0 + $0x58] sm:$0xff]  ;;  %v748_v47 = vld [vmem:[%s3209_s23 + $0x30] sm:$0xff] }
  0x1e   :  { %506 = vperm.xlu2 %2245, %v100_v25   ;;  %v747_v48 = vld [vmem:[%s3209_s23 + $0x28] sm:$0xff]  ;;  %v84_v50 = vld [vmem:[%s3204_s0 + $0x60] sm:$0xff]  ;;  %v614_v51 = vld [vmem:[%s3208_s1 + $0x10] sm:$0xff] }
  0x1f   :  { %v85_v54 = vld [vmem:[%s3204_s0 + $0x68] sm:$0xff]  ;;  %v612_v55 = vld [vmem:[%s3208_s1] sm:$0xff]  ;;  %v745_v56 = vld [vmem:[%s3209_s23 + $0x18] sm:$0xff] }
  0x20   :  { %2074 = vmatmul.msk.f32.gmra.mxu0 %vm112_vm0, %v74_v3  ;;  %v744_v57 = vld [vmem:[%s3209_s23 + $0x10] sm:$0xff]  ;;  %v746_v62 = vld [vmem:[%s3209_s23 + $0x20] sm:$0xff]  ;;  %v1262_v3 = vld [vmem:[%s3176_s13 + $0x18] sm:$0xff] }
  0x21   :  { %v86_v58 = vld [vmem:[%s3204_s0 + $0x70] sm:$0xff]  ;;  %v742_v63 = vld [vmem:[%s3209_s23] sm:$0xff]  ;;  %v1266_v4 = vld [vmem:[%s3177_s14 + $0x18] sm:$0xff] }
  0x22   :  { %559 = vperm.xlu0 %2243, %v109_v13   ;;  %2091 = vmatmul.msk.f32.gmra.mxu3 %vm112_vm0, %v91_v18  ;;  %v750_v0 = vld [vmem:[%s3175_s10] sm:$0xff]  ;;  %v743_v6 = vld [vmem:[%s3209_s23 + $0x8] sm:$0xff]  ;;  %v1399_v12 = vld [vmem:[%s3178_s16 + $0x38] sm:$0xff] }
  0x23   :  { %501 = vperm.xlu1 %2244, %v99_v16   ;;  %v754_v2 = vld [vmem:[%s3175_s10 + $0x20] sm:$0xff]  ;;  %v751_v10 = vld [vmem:[%s3175_s10 + $0x8] sm:$0xff]  ;;  %v1261_v16 = vld [vmem:[%s3176_s13 + $0x10] sm:$0xff] }
  0x24   :  { %v1259_v8 = vld [vmem:[%s3176_s13] sm:$0xff]  ;;  %v279_v14 = vld [vmem:[%s3174_s4 + $0x28] sm:$0xff]  ;;  %v1398_v18 = vld [vmem:[%s3178_s16 + $0x30] sm:$0xff] }
  0x25   :  { %449 = vmatpush.msrb.mxu3 %v279_v14  ;;  %v1397_v20 = vld [vmem:[%s3178_s16 + $0x28] sm:$0xff]  ;;  %v1406_v25 = vld [vmem:[%s3179_s17 + $0x30] sm:$0xff]  ;;  %v1404_v44 = vld [vmem:[%s3179_s17 + $0x20] sm:$0xff] }
  0x26   :  { %554 = vperm.xlu2 %2245, %v108_v30   ;;  %v1395_v30 = vld [vmem:[%s3178_s16 + $0x18] sm:$0xff]  ;;  %v1393_v49 = vld [vmem:[%s3178_s16 + $0x8] sm:$0xff] }
  0x28   :  { %2075 = vmatmul.msk.f32.gmra.mxu0 %vm112_vm0, %v75_v7  ;;  %v1260_v7 = vld [vmem:[%s3176_s13 + $0x8] sm:$0xff] }
  0x2a   :  { %496 = vperm.xlu0 %2243, %v98_v17   ;;  %2092 = vmatmul.msk.f32.gmra.mxu3 %vm112_vm0, %v92_v23 }
  0x2b   :  { %549 = vperm.xlu1 %2244, %v107_v21   ;;  %v276_v21 = vld [vmem:[%s3174_s4 + $0x10] sm:$0xff] }
  0x2e   :  { %491 = vperm.xlu2 %2245, %v97_v35   ;;  %v1403_v35 = vld [vmem:[%s3179_s17 + $0x18] sm:$0xff] }
  0x30   :  { %2076 = vmatmul.msk.f32.gmra.mxu0 %vm112_vm0, %v76_v11  ;;  %v1264_v11 = vld [vmem:[%s3177_s14 + $0x8] sm:$0xff] }
  0x32   :  { %544 = vperm.xlu0 %2243, %v106_v22   ;;  %2093 = vmatmul.msk.f32.gmra.mxu3 %vm112_vm0, %v93_v28 }
  0x33   :  { %486 = vperm.xlu1 %2244, %v96_v26   ;;  %v1405_v26 = vld [vmem:[%s3179_s17 + $0x28] sm:$0xff] }
  0x36   :  { %539 = vperm.xlu2 %2245, %v105_v40   ;;  %v1392_v40 = vld [vmem:[%s3178_s16] sm:$0xff] }
  0x38   :  { %2077 = vmatmul.msk.f32.gmra.mxu0 %vm112_vm0, %v77_v15  ;;  %v278_v15 = vld [vmem:[%s3174_s4 + $0x20] sm:$0xff] }
  0x39   :  { %450 = vmatpush.msrb.mxu3 %v278_v15 }
  0x3a   :  { %534 = vperm.xlu0 %2243, %v104_v27   ;;  %2094 = vmatmul.msk.f32.gmra.mxu3 %vm112_vm0, %v94_v33 }
  0x3b   :  { %675 = vperm.xlu1 %2244, %v611_v31   ;;  %v1394_v31 = vld [vmem:[%s3178_s16 + $0x10] sm:$0xff] }
  0x3e   :  { %670 = vperm.xlu2 %2245, %v610_v46   ;;  %v1917_v46 = vld [vmem:[%s3180_s20 + $0x10] sm:$0xff] }
  0x40   :  { %2078 = vmatmul.msk.f32.gmra.mxu0 %vm112_vm0, %v78_v19  ;;  %v277_v19 = vld [vmem:[%s3174_s4 + $0x18] sm:$0xff] }
  0x41   :  { %319 = vmatpush.msrb.mxu1 %v277_v19 }
  0x42   :  { %699 = vperm.xlu0 %2243, %v615_v32   ;;  %2095 = vmatmul.msk.f32.gmra.mxu3 %vm112_vm0, %v95_v38 }
  0x43   :  { %665 = vperm.xlu1 %2244, %v609_v36   ;;  %320 = vmatpush.msrb.mxu1 %v276_v21  ;;  %v1402_v36 = vld [vmem:[%s3179_s17 + $0x10] sm:$0xff] }
  0x46   :  { %694 = vperm.xlu2 %2245, %v614_v51   ;;  %v1920_v51 = vld [vmem:[%s3181_s21 + $0x8] sm:$0xff] }
  0x48   :  { %2079 = vmatmul.msk.f32.gmra.mxu0 %vm112_vm0, %v79_v24  ;;  %v1265_v24 = vld [vmem:[%s3177_s14 + $0x10] sm:$0xff] }
  0x4a   :  { %660 = vperm.xlu0 %2243, %v608_v37  }
  0x4b   :  { %689 = vperm.xlu1 %2244, %v613_v41   ;;  %v1400_v41 = vld [vmem:[%s3179_s17] sm:$0xff] }
  0x4e   :  { %684 = vperm.xlu2 %2245, %v612_v55   ;;  %v1921_v55 = vld [vmem:[%s3181_s21 + $0x10] sm:$0xff] }
  0x50   :  { %2080 = vmatmul.msk.f32.gmra.mxu0 %vm112_vm0, %v80_v29  ;;  %v1263_v29 = vld [vmem:[%s3177_s14] sm:$0xff] }
  0x52   :  { %1172 = vperm.xlu0 %2243, %v749_v42  }
  0x53   :  { %1167 = vperm.xlu1 %2244, %v748_v47  }
  0x56   :  { %1220 = vperm.xlu2 %2245, %v757_v59   ;;  %v1919_v59 = vld [vmem:[%s3181_s21] sm:$0xff] }
  0x58   :  { %2081 = vmatmul.msk.f32.gmra.mxu0 %vm112_vm0, %v81_v34  ;;  %v1407_v34 = vld [vmem:[%s3179_s17 + $0x38] sm:$0xff] }
  0x5a   :  { %1162 = vperm.xlu0 %2243, %v747_v48  }
  0x5b   :  { %1215 = vperm.xlu1 %2244, %v756_v52  }
  0x5e   :  { %1157 = vperm.xlu2 %2245, %v746_v62  }
  0x60   :  { %2082 = vmatmul.msk.f32.gmra.mxu0 %vm112_vm0, %v82_v39  ;;  %v1396_v39 = vld [vmem:[%s3178_s16 + $0x20] sm:$0xff] }
  0x62   :  { %1210 = vperm.xlu0 %2243, %v755_v53   ;;  %v1401_v53 = vld [vmem:[%s3179_s17 + $0x8] sm:$0xff] }
  0x63   :  { %1152 = vperm.xlu1 %2244, %v745_v56  }
  0x66   :  { %1205 = vperm.xlu2 %2245, %v754_v2  }
  0x68   :  { %2083 = vmatmul.msk.f32.gmra.mxu0 %vm112_vm0, %v83_v45  ;;  %v1915_v45 = vld [vmem:[%s3180_s20] sm:$0xff] }
  0x6a   :  { %1147 = vperm.xlu0 %2243, %v744_v57   ;;  %v1916_v57 = vld [vmem:[%s3180_s20 + $0x8] sm:$0xff] }
  0x6b   :  { %1200 = vperm.xlu1 %2244, %v753_v60  }
  0x6e   :  { %1142 = vperm.xlu2 %2245, %v743_v6  }
  0x70   :  { %2084 = vmatmul.msk.f32.gmra.mxu0 %vm112_vm0, %v84_v50  ;;  %v1918_v50 = vld [vmem:[%s3180_s20 + $0x18] sm:$0xff]  ;;  %s2247_s20 = smov 80  }
  0x72   :  { %1195 = vperm.xlu0 %2243, %v752_v61   ;;  %v1922_v61 = vld [vmem:[%s3181_s21 + $0x18] sm:$0xff]  ;;  %s2248_s21 = smov 96  }
  0x73   :  { %1137 = vperm.xlu1 %2244, %v742_v63  }
  0x76   :  { %1190 = vperm.xlu2 %2245, %v751_v10  }
  0x78   :  { %2085 = vmatmul.msk.f32.gmra.mxu0 %vm112_vm0, %v85_v54 }
  0x7a   :  { %1185 = vperm.xlu0 %2243, %v750_v0  }
  0x7b   :  { %1325 = vperm.xlu1 %2244, %v1262_v3  }
  0x7e   :  { %1320 = vperm.xlu2 %2245, %v1261_v16   ;;  %v565_v16 = vpop.permute.xlu2 %564 }
  0x80   :  { %2086 = vmatmul.msk.f32.gmra.mxu0 %vm112_vm0, %v86_v58 }
  0x82   :  { %1349 = vperm.xlu0 %2243, %v1266_v4  }
  0x83   :  { %1315 = vperm.xlu1 %2244, %v1260_v7  }
  0x85   :  { %v570_v15 = vpop.permute.xlu1 %569 }
  0x86   :  { %1344 = vperm.xlu2 %2245, %v1265_v24  }
  0x8a   :  { %1310 = vperm.xlu0 %2243, %v1259_v8  }
  0x8b   :  { %1339 = vperm.xlu1 %2244, %v1264_v11   ;;  %v522_v11 = vpop.permute.xlu0 %521 }
  0x8d   :  { %v202_v1 = vpop.f32.mrf.mxu0  ;;  %v512_v21 = vpop.permute.xlu1 %511 }
  0x8e   :  { %2104 = vmatmul.msk.f32.vlgmr.msrb.gmra.mxu2 %vm280_vm1, %v202_v1  ;;  %1334 = vperm.xlu2 %2245, %v1263_v29  }
  0x92   :  { %1828 = vperm.xlu0 %2243, %v1399_v12  }
  0x93   :  { %1823 = vperm.xlu1 %2244, %v1398_v18  }
  0x94   :  { %v250_v17 = vpop.f32.mrf.mxu2 }
  0x95   :  { %v205_v5 = vpop.f32.mrf.mxu0  ;;  %2112 = vmatmul.msk.f32.vlgmr.msrb.gmra.mxu3 %vm280_vm1, %v250_v17  ;;  %v253_v23 = vpop.f32.mrf.mxu3 }
  0x96   :  { %2105 = vmatmul.msk.f32.gmra.mxu2 %vm280_vm1, %v205_v5  ;;  %1876 = vperm.xlu2 %2245, %v1407_v34   ;;  %v517_v17 = vpop.permute.xlu0 %516 }
  0x9a   :  { %1818 = vperm.xlu0 %2243, %v1397_v20   ;;  %v247_v63 = vpop.f32.mrf.mxu1 }
  0x9b   :  { %1871 = vperm.xlu1 %2244, %v1406_v25  }
  0x9d   :  { %v208_v9 = vpop.f32.mrf.mxu0  ;;  %2113 = vmatmul.msk.f32.gmra.mxu3 %vm280_vm1, %v253_v23  ;;  %v256_v28 = vpop.f32.mrf.mxu3 }
  0x9e   :  { %2106 = vmatmul.msk.f32.gmra.mxu2 %vm280_vm1, %v208_v9  ;;  %1813 = vperm.xlu2 %2245, %v1396_v39   ;;  %v560_v24 = vpop.permute.xlu0 %559 }
  0xa2   :  { %1866 = vperm.xlu0 %2243, %v1405_v26  }
  0xa3   :  { %1808 = vperm.xlu1 %2244, %v1395_v30  }
  0xa5   :  { %v211_v13 = vpop.f32.mrf.mxu0  ;;  %2114 = vmatmul.msk.f32.gmra.mxu3 %vm280_vm1, %v256_v28  ;;  %v259_v33 = vpop.f32.mrf.mxu3 }
  0xa6   :  { %2107 = vmatmul.msk.f32.gmra.mxu2 %vm280_vm1, %v211_v13  ;;  %1861 = vperm.xlu2 %2245, %v1404_v44  }
  0xaa   :  { %1803 = vperm.xlu0 %2243, %v1394_v31  }
  0xab   :  { %1856 = vperm.xlu1 %2244, %v1403_v35  }
  0xad   :  { %v214_v22 = vpop.f32.mrf.mxu0  ;;  %2115 = vmatmul.msk.f32.gmra.mxu3 %vm280_vm1, %v259_v33  ;;  %v262_v38 = vpop.f32.mrf.mxu3 }
  0xae   :  { %2108 = vmatmul.msk.f32.gmra.mxu2 %vm280_vm1, %v214_v22  ;;  %1798 = vperm.xlu2 %2245, %v1393_v49   ;;  %v507_v22 = vpop.permute.xlu2 %506 }
  0xb2   :  { %1851 = vperm.xlu0 %2243, %v1402_v36  }
  0xb3   :  { %1793 = vperm.xlu1 %2244, %v1392_v40  }
  0xb5   :  { %v217_v27 = vpop.f32.mrf.mxu0  ;;  %2116 = vmatmul.msk.f32.gmra.mxu3 %vm280_vm1, %v262_v38  ;;  %v265_v43 = vpop.f32.mrf.mxu3 }
  0xb6   :  { %2109 = vmatmul.msk.f32.gmra.mxu2 %vm280_vm1, %v217_v27  ;;  %1846 = vperm.xlu2 %2245, %v1401_v53   ;;  %v502_v27 = vpop.permute.xlu1 %501  ;;  %v555_v30 = vpop.permute.xlu2 %554 }
  0xba   :  { %1841 = vperm.xlu0 %2243, %v1400_v41  }
  0xbb   :  { %1966 = vperm.xlu1 %2244, %v1915_v45  }
  0xbd   :  { %v220_v32 = vpop.f32.mrf.mxu0  ;;  %2117 = vmatmul.msk.f32.gmra.mxu3 %vm280_vm1, %v265_v43  ;;  %v268_v48 = vpop.f32.mrf.mxu3 }
  0xbe   :  { %2110 = vmatmul.msk.f32.gmra.mxu2 %vm280_vm1, %v220_v32  ;;  %1971 = vperm.xlu2 %2245, %v1916_v57   ;;  %v497_v32 = vpop.permute.xlu0 %496  ;;  %v550_v44 = vpop.permute.xlu1 %549 }
  0xbf   :  { %v492_v49 = vpop.permute.xlu2 %491 }
  0xc2   :  { %1976 = vperm.xlu0 %2243, %v1917_v46  }
  0xc3   :  { %1981 = vperm.xlu1 %2244, %v1918_v50  }
  0xc5   :  { %v223_v37 = vpop.f32.mrf.mxu0  ;;  %2118 = vmatmul.msk.f32.gmra.mxu3 %vm280_vm1, %v268_v48  ;;  %v271_v54 = vpop.f32.mrf.mxu3 }
  0xc6   :  { %2111 = vmatmul.msk.f32.gmra.mxu2 %vm280_vm1, %v223_v37  ;;  %1990 = vperm.xlu2 %2245, %v1919_v59  }
  0xca   :  { %1995 = vperm.xlu0 %2243, %v1920_v51  }
  0xcb   :  { %2000 = vperm.xlu1 %2244, %v1921_v55   ;;  %v545_v55 = vpop.permute.xlu0 %544 }
  0xcd   :  { %v226_v42 = vpop.f32.mrf.mxu0  ;;  %2119 = vmatmul.msk.f32.gmra.mxu3 %vm280_vm1, %v271_v54 }
  0xce   :  { %2096 = vmatmul.msk.f32.vlgmr.msrb.gmra.mxu1 %vm280_vm1, %v226_v42  ;;  %2005 = vperm.xlu2 %2245, %v1922_v61  }
  0xd5   :  { %v229_v47 = vpop.f32.mrf.mxu0 }
  0xd6   :  { %2097 = vmatmul.msk.f32.gmra.mxu1 %vm280_vm1, %v229_v47 }
  0xdd   :  { %v232_v52 = vpop.f32.mrf.mxu0 }
  0xde   :  { %2098 = vmatmul.msk.f32.gmra.mxu1 %vm280_vm1, %v232_v52 }
  0xe5   :  { %v235_v56 = vpop.f32.mrf.mxu0 }
  0xe6   :  { %2099 = vmatmul.msk.f32.gmra.mxu1 %vm280_vm1, %v235_v56 }
  0xed   :  { %v238_v58 = vpop.f32.mrf.mxu0 }
  0xee   :  { %2100 = vmatmul.msk.f32.gmra.mxu1 %vm280_vm1, %v238_v58 }
  0xf5   :  { %v241_v60 = vpop.f32.mrf.mxu0 }
  0xf6   :  { %2101 = vmatmul.msk.f32.gmra.mxu1 %vm280_vm1, %v241_v60 }
  0xfd   :  { %v244_v62 = vpop.f32.mrf.mxu0 }
  0xfe   :  { %2102 = vmatmul.msk.f32.gmra.mxu1 %vm280_vm1, %v244_v62 }
 0x106   :  { %2103 = vmatmul.msk.f32.gmra.mxu1 %vm280_vm1, %v247_v63 }
 0x111   :  { %v387_v0 = vpop.f32.mrf.mxu2 }
 0x118   :  { %v452_v1 = vpop.f32.mrf.mxu3 }
 0x119   :  { %v390_v2 = vpop.f32.mrf.mxu2 }
 0x120   :  { %v455_v3 = vpop.f32.mrf.mxu3 }
 0x121   :  { %v393_v5 = vpop.f32.mrf.mxu2 }
 0x128   :  { %v458_v6 = vpop.f32.mrf.mxu3 }
 0x129   :  { %v396_v8 = vpop.f32.mrf.mxu2 }
 0x130   :  { %v461_v10 = vpop.f32.mrf.mxu3 }
 0x131   :  { %v399_v13 = vpop.f32.mrf.mxu2 }
 0x138   :  { %v464_v14 = vpop.f32.mrf.mxu3 }
 0x139   :  { %v402_v19 = vpop.f32.mrf.mxu2 }
 0x140   :  { %v467_v20 = vpop.f32.mrf.mxu3 }
 0x141   :  { %v405_v25 = vpop.f32.mrf.mxu2 }
 0x148   :  { %v470_v26 = vpop.f32.mrf.mxu3 }
 0x149   :  { %v408_v35 = vpop.f32.mrf.mxu2 }
 0x14b   :  { %v322_v4 = vpop.f32.mrf.mxu1 }
 0x14c   :  { %v388_v50 = vadd.f32 %v387_v0, %v322_v4  ;;  %v487_v4 = vpop.permute.xlu1 %486 }
 0x14e   :  { %v476_v60 = vadd.f32 %v452_v1, %v388_v50 }
 0x150   :  { %v473_v40 = vpop.f32.mrf.mxu3 }
 0x153   :  { %v325_v7 = vpop.f32.mrf.mxu1 }
 0x154   :  { %v391_v45 = vadd.f32 %v390_v2, %v325_v7 }
 0x156   :  { %v477_v56 = vadd.f32 %v455_v3, %v391_v45 }
 0x15b   :  { %v328_v9 = vpop.f32.mrf.mxu1 }
 0x15c   :  { %v394_v38 = vadd.f32 %v393_v5, %v328_v9  ;;  %v525_v5 = vmul.f32 %v492_v49, %v477_v56 }
 0x15e   :  { %v478_v51 = vadd.f32 %v458_v6, %v394_v38  ;;  %v524_v6 = vmul.f32 %v487_v4, %v476_v60  ;;  %v722_v60 = vld [vmem:[%s3183_s8 + $0x20] sm:$0xff]  ;;  %v922_v4 = vld [vmem:[%s3184_s11 + $0x10] sm:$0xff] }
 0x160   :  { %v526_v61 = vmul.f32 %v497_v32, %v478_v51 }
 0x162   :  { %v574_v9 = vadd.f32 %v545_v55, %v526_v61  ;;  %v718_v55 = vld [vmem:[%s3183_s8] sm:$0xff]  ;;  %v723_v61 = vld [vmem:[%s3183_s8 + $0x28] sm:$0xff] }
 0x163   :  { %v331_v12 = vpop.f32.mrf.mxu1 }
 0x164   :  { %v397_v36 = vadd.f32 %v396_v8, %v331_v12  ;;  %vm582_vm7 = vcmp.ge.f32.partialorder %v574_v9, 0.0 }
 0x166   :  { %v479_v46 = vadd.f32 %v461_v10, %v397_v36 }
 0x168   :  { %v527_v57 = vmul.f32 %v502_v27, %v479_v46  ;;  %v607_v27 = vld [vmem:[%s3182_s5 + $0x18] sm:$0xff] }
 0x16a   :  { %v575_v7 = vadd.f32 %v550_v44, %v527_v57  ;;  %v719_v57 = vld [vmem:[%s3183_s8 + $0x8] sm:$0xff] }
 0x16b   :  { %v334_v18 = vpop.f32.mrf.mxu1 }
 0x16c   :  { %v400_v33 = vadd.f32 %v399_v13, %v334_v18  ;;  %v591_v13 = vmul.f32 0.2, %v575_v7  ;;  %vm583_vm6 = vcmp.ge.f32.partialorder %v575_v7, 0.0 }
 0x16e   :  { %v480_v41 = vadd.f32 %v464_v14, %v400_v33  ;;  %v535_v14 = vpop.permute.xlu0 %534  ;;  %v599_v18 = vsel %vm583_vm6, %v575_v7, %v591_v13  ;;  %v728_v7 = vld [vmem:[%s3183_s8 + $0x50] sm:$0xff] }
 0x170   :  { %v528_v52 = vmul.f32 %v507_v22, %v480_v41 }
 0x172   :  { %v576_v62 = vadd.f32 %v555_v30, %v528_v52 }
 0x173   :  { %v337_v23 = vpop.f32.mrf.mxu1 }
 0x174   :  { %v403_v31 = vadd.f32 %v402_v19, %v337_v23  ;;  %v592_v10 = vmul.f32 0.2, %v576_v62  ;;  %vm584_vm5 = vcmp.ge.f32.partialorder %v576_v62, 0.0  ;;  %v604_v23 = vld [vmem:[%s3182_s5] sm:$0xff] }
 0x176   :  { %v481_v37 = vadd.f32 %v467_v20, %v403_v31  ;;  %v700_v32 = vpop.permute.xlu0 %699 }
 0x178   :  { %v529_v47 = vmul.f32 %v512_v21, %v481_v37 }
 0x17a   :  { %v577_v58 = vadd.f32 %v560_v24, %v529_v47 }
 0x17b   :  { %v340_v28 = vpop.f32.mrf.mxu1 }
 0x17c   :  { %v406_v29 = vadd.f32 %v405_v25, %v340_v28  ;;  %v593_v0 = vmul.f32 0.2, %v577_v58  ;;  %vm585_vm4 = vcmp.ge.f32.partialorder %v577_v58, 0.0  ;;  %v605_v25 = vld [vmem:[%s3182_s5 + $0x8] sm:$0xff] }
 0x17e   :  { %v482_v34 = vadd.f32 %v470_v26, %v406_v29  ;;  %v601_v12 = vsel %vm585_vm4, %v577_v58, %v593_v0  ;;  %v606_v26 = vld [vmem:[%s3182_s5 + $0x10] sm:$0xff]  ;;  %v676_v29 = vpop.permute.xlu1 %675  ;;  %v661_v38 = vpop.permute.xlu0 %660  ;;  %v923_v0 = vld [vmem:[%s3184_s11 + $0x18] sm:$0xff] }
 0x17f   :  { %v720_v58 = vld [vmem:[%s3183_s8 + $0x10] sm:$0xff] }
 0x180   :  { %v530_v42 = vmul.f32 %v517_v17, %v482_v34  ;;  %v590_v17 = vmul.f32 0.2, %v574_v9 }
 0x182   :  { %v578_v53 = vadd.f32 %v565_v16, %v530_v42  ;;  %v600_v16 = vsel %vm584_vm5, %v576_v62, %v592_v10  ;;  %v598_v20 = vsel %vm582_vm7, %v574_v9, %v590_v17  ;;  %v724_v62 = vld [vmem:[%s3183_s8 + $0x30] sm:$0xff]  ;;  %v921_v9 = vld [vmem:[%s3184_s11 + $0x8] sm:$0xff] }
 0x183   :  { %v343_v39 = vpop.f32.mrf.mxu1  ;;  %v731_v10 = vld [vmem:[%s3183_s8 + $0x68] sm:$0xff] }
 0x184   :  { %v409_v43 = vadd.f32 %v408_v35, %v343_v39  ;;  %v594_v2 = vmul.f32 0.2, %v578_v53  ;;  %vm586_vm3 = vcmp.ge.f32.partialorder %v578_v53, 0.0 }
 0x186   :  { %v483_v48 = vadd.f32 %v473_v40, %v409_v43  ;;  %v602_v3 = vsel %vm586_vm3, %v578_v53, %v594_v2  ;;  %v666_v33 = vpop.permute.xlu1 %665  ;;  %v726_v2 = vld [vmem:[%s3183_s8 + $0x40] sm:$0xff] }
 0x188   :  { %v531_v54 = vmul.f32 %v522_v11, %v483_v48  ;;  %v540_v11 = vpop.permute.xlu2 %539 }
 0x189   :  { %v573_v1 = vadd.f32 %v540_v11, %v525_v5  ;;  %v727_v5 = vld [vmem:[%s3183_s8 + $0x48] sm:$0xff]  ;;  %v732_v11 = vld [vmem:[%s3183_s8 + $0x70] sm:$0xff] }
 0x18a   :  { %v579_v59 = vadd.f32 %v570_v15, %v531_v54  ;;  %v572_v15 = vadd.f32 %v535_v14, %v524_v6  ;;  %v730_v6 = vld [vmem:[%s3183_s8 + $0x60] sm:$0xff]  ;;  %v735_v14 = vld [vmem:[%s3183_s8 + $0x88] sm:$0xff] }
 0x18b   :  { %v589_v19 = vmul.f32 0.2, %v573_v1  ;;  %vm581_vm8 = vcmp.ge.f32.partialorder %v573_v1, 0.0 }
 0x18c   :  { %vm587_vm2 = vcmp.ge.f32.partialorder %v579_v59, 0.0  ;;  %v595_v63 = vmul.f32 0.2, %v579_v59  ;;  %v588_v21 = vmul.f32 0.2, %v572_v15  ;;  %vm580_vm9 = vcmp.ge.f32.partialorder %v572_v15, 0.0 }
 0x18d   :  { %v597_v22 = vsel %vm581_vm8, %v573_v1, %v589_v19  ;;  %v733_v1 = vld [vmem:[%s3183_s8 + $0x78] sm:$0xff] }
 0x18e   :  { %v603_v8 = vsel %vm587_vm2, %v579_v59, %v595_v63  ;;  %v596_v24 = vsel %vm580_vm9, %v572_v15, %v588_v21  ;;  %v690_v43 = vpop.permute.xlu1 %689  ;;  %v721_v59 = vld [vmem:[%s3183_s8 + $0x18] sm:$0xff]  ;;  %v926_v21 = vld [vmem:[%s3184_s11 + $0x30] sm:$0xff] }
 0x18f   :  { %637 = vmatpush.msra.mxu1 %v603_v8  ;;  %v725_v63 = vld [vmem:[%s3183_s8 + $0x38] sm:$0xff] }
 0x190   :  { %v671_v30 = vpop.permute.xlu2 %670  ;;  %v729_v8 = vld [vmem:[%s3183_s8 + $0x58] sm:$0xff] }
 0x191   :  { %638 = vmatpush.msra.mxu1 %v602_v3  ;;  %v920_v3 = vld [vmem:[%s3184_s11] sm:$0xff] }
 0x193   :  { %639 = vmatpush.msra.mxu1 %v601_v12  ;;  %v734_v12 = vld [vmem:[%s3183_s8 + $0x80] sm:$0xff] }
 0x195   :  { %640 = vmatpush.msra.mxu1 %v600_v16  ;;  %v736_v16 = vld [vmem:[%s3183_s8 + $0x90] sm:$0xff] }
 0x197   :  { %641 = vmatpush.msra.mxu1 %v599_v18  ;;  %v737_v18 = vld [vmem:[%s3183_s8 + $0x98] sm:$0xff] }
 0x198   :  { %v695_v35 = vpop.permute.xlu2 %694 }
 0x199   :  { %642 = vmatpush.msra.mxu1 %v598_v20  ;;  %v927_v20 = vld [vmem:[%s3184_s11 + $0x38] sm:$0xff] }
 0x19a   :  { %968 = vmatpush.msra.mxu3 %v927_v20 }
 0x19b   :  { %643 = vmatpush.msra.mxu1 %v597_v22  ;;  %v738_v22 = vld [vmem:[%s3183_s8 + $0xa0] sm:$0xff] }
 0x19c   :  { %969 = vmatpush.msra.mxu3 %v926_v21 }
 0x19d   :  { %644 = vmatpush.msra.mxu1 %v596_v24  ;;  %v924_v24 = vld [vmem:[%s3184_s11 + $0x20] sm:$0xff] }
 0x19e   :  { %2120 = vmatmul.msk.f32.vlgmr.msra.gmra.mxu1 %vm616_vm10, %v604_v23  ;;  %v925_v23 = vld [vmem:[%s3184_s11 + $0x28] sm:$0xff] }
 0x19f   :  { %1033 = vmatpush.msrb.mxu1 %v923_v0  ;;  %970 = vmatpush.msra.mxu3 %v925_v23 }
 0x1a0   :  { %v685_v46 = vpop.permute.xlu2 %684 }
 0x1a1   :  { %1034 = vmatpush.msrb.mxu1 %v922_v4  ;;  %971 = vmatpush.msra.mxu3 %v924_v24  ;;  %v1173_v4 = vpop.permute.xlu0 %1172 }
 0x1a3   :  { %1035 = vmatpush.msrb.mxu1 %v921_v9 }
 0x1a5   :  { %1036 = vmatpush.msrb.mxu1 %v920_v3  ;;  %v1168_v3 = vpop.permute.xlu1 %1167 }
 0x1a6   :  { %2121 = vmatmul.msk.f32.gmra.mxu1 %vm616_vm10, %v605_v25 }
 0x1ae   :  { %2122 = vmatmul.msk.f32.gmra.mxu1 %vm616_vm10, %v606_v26  ;;  %v739_v26 = vld [vmem:[%s3183_s8 + $0xa8] sm:$0xff] }
 0x1b6   :  { %2123 = vmatmul.msk.f32.gmra.mxu1 %vm616_vm10, %v607_v27 }
 0x21b   :  { %v646_v28 = vpop.f32.mrf.mxu1 }
 0x21c   :  { %v678_v40 = vmul.f32 %v661_v38, %v646_v28  ;;  %v740_v28 = vld [vmem:[%s3183_s8 + $0xb0] sm:$0xff]  ;;  %v929_v38 = vld [vmem:[%s3184_s11 + $0x48] sm:$0xff] }
 0x21e   :  { %v702_v47 = vadd.f32 %v685_v46, %v678_v40 }
 0x220   :  { %v710_v53 = vmul.f32 0.2, %v702_v47  ;;  %vm706_vm14 = vcmp.ge.f32.partialorder %v702_v47, 0.0 }
 0x222   :  { %v714_v56 = vsel %vm706_vm14, %v702_v47, %v710_v53  ;;  %vm1587_vm14 = vcmask 392192  }
 0x223   :  { %v649_v31 = vpop.f32.mrf.mxu1 }
 0x224   :  { %v679_v37 = vmul.f32 %v666_v33, %v649_v31 }
 0x226   :  { %v703_v44 = vadd.f32 %v690_v43, %v679_v37  ;;  %v930_v37 = vld [vmem:[%s3184_s11 + $0x50] sm:$0xff] }
 0x228   :  { %v711_v51 = vmul.f32 0.2, %v703_v44  ;;  %vm707_vm13 = vcmp.ge.f32.partialorder %v703_v44, 0.0 }
 0x22a   :  { %v715_v54 = vsel %vm707_vm13, %v703_v44, %v711_v51 }
 0x22b   :  { %v652_v34 = vpop.f32.mrf.mxu1 }
 0x22c   :  { %v680_v36 = vmul.f32 %v671_v30, %v652_v34  ;;  %v741_v30 = vld [vmem:[%s3183_s8 + $0xb8] sm:$0xff]  ;;  %s2249_s8 = smov 112  }
 0x22e   :  { %v704_v41 = vadd.f32 %v695_v35, %v680_v36  ;;  %v931_v36 = vld [vmem:[%s3184_s11 + $0x58] sm:$0xff] }
 0x22f   :  { %1098 = vmatpush.msrb.mxu3 %v931_v36 }
 0x230   :  { %v712_v49 = vmul.f32 0.2, %v704_v41  ;;  %vm708_vm12 = vcmp.ge.f32.partialorder %v704_v41, 0.0 }
 0x231   :  { %1099 = vmatpush.msrb.mxu3 %v930_v37 }
 0x232   :  { %v716_v52 = vsel %vm708_vm12, %v704_v41, %v712_v49 }
 0x233   :  { %v655_v39 = vpop.f32.mrf.mxu1  ;;  %1100 = vmatpush.msrb.mxu3 %v929_v38 }
 0x234   :  { %v681_v42 = vmul.f32 %v676_v29, %v655_v39  ;;  %v928_v39 = vld [vmem:[%s3184_s11 + $0x40] sm:$0xff] }
 0x235   :  { %1101 = vmatpush.msrb.mxu3 %v928_v39 }
 0x236   :  { %v705_v45 = vadd.f32 %v700_v32, %v681_v42 }
 0x238   :  { %vm709_vm11 = vcmp.ge.f32.partialorder %v705_v45, 0.0  ;;  %v713_v48 = vmul.f32 0.2, %v705_v45 }
 0x23a   :  { %v717_v50 = vsel %vm709_vm11, %v705_v45, %v713_v48 }
 0x23b   :  { %843 = vmatpush.msra.mxu2 %v717_v50 }
 0x23d   :  { %844 = vmatpush.msra.mxu2 %v716_v52 }
 0x23f   :  { %845 = vmatpush.msra.mxu2 %v715_v54 }
 0x241   :  { %846 = vmatpush.msra.mxu2 %v714_v56 }
 0x242   :  { %2124 = vmatmul.msk.f32.vlgmr.msra.gmra.mxu2 %vm758_vm15, %v718_v55 }
 0x24a   :  { %2125 = vmatmul.msk.f32.gmra.mxu2 %vm758_vm15, %v719_v57 }
 0x252   :  { %2126 = vmatmul.msk.f32.gmra.mxu2 %vm758_vm15, %v720_v58 }
 0x25a   :  { %2127 = vmatmul.msk.f32.gmra.mxu2 %vm758_vm15, %v721_v59 }
 0x262   :  { %2128 = vmatmul.msk.f32.gmra.mxu2 %vm758_vm15, %v722_v60 }
 0x26a   :  { %2129 = vmatmul.msk.f32.gmra.mxu2 %vm758_vm15, %v723_v61 }
 0x272   :  { %2130 = vmatmul.msk.f32.gmra.mxu2 %vm758_vm15, %v724_v62 }
 0x27a   :  { %2131 = vmatmul.msk.f32.gmra.mxu2 %vm758_vm15, %v725_v63 }
 0x282   :  { %2132 = vmatmul.msk.f32.gmra.mxu2 %vm758_vm15, %v726_v2 }
 0x28a   :  { %2133 = vmatmul.msk.f32.gmra.mxu2 %vm758_vm15, %v727_v5 }
 0x292   :  { %2134 = vmatmul.msk.f32.gmra.mxu2 %vm758_vm15, %v728_v7 }
 0x29a   :  { %2135 = vmatmul.msk.f32.gmra.mxu2 %vm758_vm15, %v729_v8 }
 0x2a2   :  { %2136 = vmatmul.msk.f32.gmra.mxu2 %vm758_vm15, %v730_v6 }
 0x2aa   :  { %2137 = vmatmul.msk.f32.gmra.mxu2 %vm758_vm15, %v731_v10  ;;  %v1221_v10 = vpop.permute.xlu2 %1220 }
 0x2b2   :  { %2138 = vmatmul.msk.f32.gmra.mxu2 %vm758_vm15, %v732_v11  ;;  %v1163_v11 = vpop.permute.xlu0 %1162 }
 0x2ba   :  { %2139 = vmatmul.msk.f32.gmra.mxu2 %vm758_vm15, %v733_v1 }
 0x2c2   :  { %2140 = vmatmul.msk.f32.gmra.mxu2 %vm758_vm15, %v734_v12 }
 0x2c5   :  { %v848_v13 = vpop.f32.mrf.mxu2 }
 0x2c6   :  { %2156 = vmatmul.msk.f32.vlgmr.msrb.gmra.mxu1 %vm758_vm15, %v848_v13  ;;  %v1216_v13 = vpop.permute.xlu1 %1215 }
 0x2ca   :  { %2141 = vmatmul.msk.f32.gmra.mxu2 %vm758_vm15, %v735_v14  ;;  %v1158_v14 = vpop.permute.xlu2 %1157 }
 0x2cd   :  { %v851_v15 = vpop.f32.mrf.mxu2 }
 0x2ce   :  { %2157 = vmatmul.msk.f32.gmra.mxu1 %vm758_vm15, %v851_v15  ;;  %v1211_v15 = vpop.permute.xlu0 %1210 }
 0x2d2   :  { %2142 = vmatmul.msk.f32.gmra.mxu2 %vm758_vm15, %v736_v16 }
 0x2d5   :  { %v854_v17 = vpop.f32.mrf.mxu2 }
 0x2d6   :  { %2158 = vmatmul.msk.f32.gmra.mxu1 %vm758_vm15, %v854_v17 }
 0x2da   :  { %2143 = vmatmul.msk.f32.gmra.mxu2 %vm758_vm15, %v737_v18  ;;  %v1153_v18 = vpop.permute.xlu1 %1152 }
 0x2dd   :  { %v857_v19 = vpop.f32.mrf.mxu2 }
 0x2de   :  { %2159 = vmatmul.msk.f32.gmra.mxu1 %vm758_vm15, %v857_v19  ;;  %v1206_v19 = vpop.permute.xlu2 %1205 }
 0x2e2   :  { %2144 = vmatmul.msk.f32.gmra.mxu2 %vm758_vm15, %v738_v22  ;;  %v1148_v22 = vpop.permute.xlu0 %1147 }
 0x2e5   :  { %v860_v25 = vpop.f32.mrf.mxu2 }
 0x2e6   :  { %2160 = vmatmul.msk.f32.gmra.mxu1 %vm758_vm15, %v860_v25  ;;  %v1143_v38 = vpop.permute.xlu2 %1142 }
 0x2ea   :  { %2145 = vmatmul.msk.f32.gmra.mxu2 %vm758_vm15, %v739_v26 }
 0x2ed   :  { %v863_v27 = vpop.f32.mrf.mxu2 }
 0x2ee   :  { %2161 = vmatmul.msk.f32.gmra.mxu1 %vm758_vm15, %v863_v27 }
 0x2f2   :  { %2146 = vmatmul.msk.f32.gmra.mxu2 %vm758_vm15, %v740_v28 }
 0x2f5   :  { %v866_v29 = vpop.f32.mrf.mxu2 }
 0x2f6   :  { %2162 = vmatmul.msk.f32.gmra.mxu1 %vm758_vm15, %v866_v29 }
 0x2fa   :  { %2147 = vmatmul.msk.f32.gmra.mxu2 %vm758_vm15, %v741_v30 }
 0x2fd   :  { %v869_v31 = vpop.f32.mrf.mxu2 }
 0x2fe   :  { %2163 = vmatmul.msk.f32.gmra.mxu1 %vm758_vm15, %v869_v31 }
 0x305   :  { %v872_v32 = vpop.f32.mrf.mxu2 }
 0x306   :  { %2148 = vmatmul.msk.f32.vlgmr.msra.gmra.mxu3 %vm758_vm15, %v872_v32  ;;  %v1201_v32 = vpop.permute.xlu1 %1200 }
 0x30d   :  { %v875_v33 = vpop.f32.mrf.mxu2 }
 0x30e   :  { %2149 = vmatmul.msk.f32.gmra.mxu3 %vm758_vm15, %v875_v33 }
 0x315   :  { %v878_v34 = vpop.f32.mrf.mxu2 }
 0x316   :  { %2150 = vmatmul.msk.f32.gmra.mxu3 %vm758_vm15, %v878_v34 }
 0x31d   :  { %v881_v35 = vpop.f32.mrf.mxu2 }
 0x31e   :  { %2151 = vmatmul.msk.f32.gmra.mxu3 %vm758_vm15, %v881_v35 }
 0x325   :  { %v884_v40 = vpop.f32.mrf.mxu2 }
 0x326   :  { %2152 = vmatmul.msk.f32.gmra.mxu3 %vm758_vm15, %v884_v40 }
 0x32d   :  { %v887_v41 = vpop.f32.mrf.mxu2 }
 0x32e   :  { %2153 = vmatmul.msk.f32.gmra.mxu3 %vm758_vm15, %v887_v41 }
 0x335   :  { %v890_v42 = vpop.f32.mrf.mxu2 }
 0x336   :  { %2154 = vmatmul.msk.f32.gmra.mxu3 %vm758_vm15, %v890_v42 }
 0x33d   :  { %v893_v43 = vpop.f32.mrf.mxu2 }
 0x33e   :  { %2155 = vmatmul.msk.f32.gmra.mxu3 %vm758_vm15, %v893_v43 }
 0x343   :  { %v1038_v58 = vpop.f32.mrf.mxu1 }
 0x345   :  { %v896_v44 = vpop.f32.mrf.mxu2 }
 0x346   :  { %2164 = vmatmul.msk.f32.vlgmr.msrb.gmra.mxu3 %vm758_vm15, %v896_v44  ;;  %v1196_v44 = vpop.permute.xlu0 %1195 }
 0x34b   :  { %v1041_v61 = vpop.f32.mrf.mxu1 }
 0x34d   :  { %v899_v45 = vpop.f32.mrf.mxu2 }
 0x34e   :  { %2165 = vmatmul.msk.f32.gmra.mxu3 %vm758_vm15, %v899_v45 }
 0x353   :  { %v1044_v5 = vpop.f32.mrf.mxu1 }
 0x355   :  { %v902_v46 = vpop.f32.mrf.mxu2 }
 0x356   :  { %2166 = vmatmul.msk.f32.gmra.mxu3 %vm758_vm15, %v902_v46 }
 0x35b   :  { %v1047_v8 = vpop.f32.mrf.mxu1 }
 0x35d   :  { %v905_v47 = vpop.f32.mrf.mxu2 }
 0x35e   :  { %2167 = vmatmul.msk.f32.gmra.mxu3 %vm758_vm15, %v905_v47 }
 0x363   :  { %v1050_v6 = vpop.f32.mrf.mxu1 }
 0x365   :  { %v908_v48 = vpop.f32.mrf.mxu2 }
 0x366   :  { %2168 = vmatmul.msk.f32.gmra.mxu3 %vm758_vm15, %v908_v48 }
 0x36b   :  { %v1053_v12 = vpop.f32.mrf.mxu1 }
 0x36d   :  { %v911_v49 = vpop.f32.mrf.mxu2 }
 0x36e   :  { %2169 = vmatmul.msk.f32.gmra.mxu3 %vm758_vm15, %v911_v49 }
 0x373   :  { %v1056_v17 = vpop.f32.mrf.mxu1 }
 0x375   :  { %v914_v50 = vpop.f32.mrf.mxu2 }
 0x376   :  { %2170 = vmatmul.msk.f32.gmra.mxu3 %vm758_vm15, %v914_v50 }
 0x37b   :  { %v1059_v27 = vpop.f32.mrf.mxu1 }
 0x37d   :  { %v917_v51 = vpop.f32.mrf.mxu2 }
 0x37e   :  { %2171 = vmatmul.msk.f32.gmra.mxu3 %vm758_vm15, %v917_v51 }
 0x389   :  { %v973_v52 = vpop.f32.mrf.mxu3 }
 0x38a   :  { %v1039_v62 = vadd.f32 %v1038_v58, %v973_v52  ;;  %v1138_v58 = vpop.permute.xlu1 %1137 }
 0x391   :  { %v976_v53 = vpop.f32.mrf.mxu3 }
 0x392   :  { %v1042_v40 = vadd.f32 %v1041_v61, %v976_v53 }
 0x399   :  { %v979_v54 = vpop.f32.mrf.mxu3 }
 0x39a   :  { %v1045_v33 = vadd.f32 %v1044_v5, %v979_v54 }
 0x3a1   :  { %v982_v55 = vpop.f32.mrf.mxu3 }
 0x3a2   :  { %v1048_v28 = vadd.f32 %v1047_v8, %v982_v55  ;;  %v1186_v8 = vpop.permute.xlu0 %1185 }
 0x3a9   :  { %v985_v56 = vpop.f32.mrf.mxu3 }
 0x3aa   :  { %v1051_v25 = vadd.f32 %v1050_v6, %v985_v56 }
 0x3b1   :  { %v988_v57 = vpop.f32.mrf.mxu3 }
 0x3b2   :  { %v1054_v23 = vadd.f32 %v1053_v12, %v988_v57  ;;  %v1257_v12 = vld [vmem:[%s3185_s12 + $0x10] sm:$0xff] }
 0x3b9   :  { %v991_v59 = vpop.f32.mrf.mxu3 }
 0x3ba   :  { %v1057_v21 = vadd.f32 %v1056_v17, %v991_v59 }
 0x3c1   :  { %v994_v60 = vpop.f32.mrf.mxu3 }
 0x3c2   :  { %v1060_v29 = vadd.f32 %v1059_v27, %v994_v60 }
 0x3c9   :  { %v1103_v63 = vpop.f32.mrf.mxu3 }
 0x3ca   :  { %v2894_v2 = vadd.f32 %v1103_v63, %v1039_v62  ;;  %v1191_v62 = vpop.permute.xlu2 %1190 }
 0x3cc   :  { %v1175_v53 = vmul.f32 %v1138_v58, %v2894_v2  ;;  %v1379_v58 = vld [vmem:[%s3186_s15 + $0x58] sm:$0xff] }
 0x3d1   :  { %v1106_v7 = vpop.f32.mrf.mxu3 }
 0x3d2   :  { %v1128_v45 = vadd.f32 %v1106_v7, %v1042_v40  ;;  %v1321_v17 = vpop.permute.xlu2 %1320 }
 0x3d4   :  { %v1176_v54 = vmul.f32 %v1143_v38, %v1128_v45  ;;  %v1369_v45 = vld [vmem:[%s3186_s15 + $0x8] sm:$0xff] }
 0x3d6   :  { %v1224_v63 = vadd.f32 %v1191_v62, %v1176_v54  ;;  %v1377_v54 = vld [vmem:[%s3186_s15 + $0x48] sm:$0xff]  ;;  %v1380_v62 = vld [vmem:[%s3186_s15 + $0x60] sm:$0xff] }
 0x3d8   :  { %vm1232_vm7 = vcmp.ge.f32.partialorder %v1224_v63, 0.0 }
 0x3d9   :  { %v1109_v0 = vpop.f32.mrf.mxu3 }
 0x3da   :  { %v1129_v39 = vadd.f32 %v1109_v0, %v1045_v33  ;;  %v1223_v0 = vadd.f32 %v1186_v8, %v1175_v53  ;;  %v1572_v53 = vld [vmem:[%s3187_s18 + $0x18] sm:$0xff] }
 0x3dc   :  { %v1177_v49 = vmul.f32 %v1148_v22, %v1129_v39  ;;  %vm1231_vm8 = vcmp.ge.f32.partialorder %v1223_v0, 0.0  ;;  %v1345_v22 = vpop.permute.xlu2 %1344 }
 0x3de   :  { %v1225_v59 = vadd.f32 %v1196_v44, %v1177_v49  ;;  %v1373_v49 = vld [vmem:[%s3186_s15 + $0x28] sm:$0xff] }
 0x3e0   :  { %v1241_v6 = vmul.f32 0.2, %v1225_v59  ;;  %vm1233_vm6 = vcmp.ge.f32.partialorder %v1225_v59, 0.0 }
 0x3e1   :  { %v1112_v9 = vpop.f32.mrf.mxu3 }
 0x3e2   :  { %v1130_v35 = vadd.f32 %v1112_v9, %v1048_v28  ;;  %v1240_v9 = vmul.f32 0.2, %v1224_v63 }
 0x3e4   :  { %v1178_v46 = vmul.f32 %v1153_v18, %v1130_v35 }
 0x3e6   :  { %v1226_v55 = vadd.f32 %v1201_v32, %v1178_v46  ;;  %v1370_v46 = vld [vmem:[%s3186_s15 + $0x10] sm:$0xff] }
 0x3e8   :  { %v1242_v7 = vmul.f32 0.2, %v1226_v55  ;;  %vm1234_vm5 = vcmp.ge.f32.partialorder %v1226_v55, 0.0 }
 0x3e9   :  { %v1115_v1 = vpop.f32.mrf.mxu3 }
 0x3ea   :  { %v1131_v30 = vadd.f32 %v1115_v1, %v1051_v25  ;;  %v1250_v2 = vsel %vm1234_vm5, %v1226_v55, %v1242_v7  ;;  %v1255_v1 = vld [vmem:[%s3185_s12] sm:$0xff]  ;;  %v1378_v55 = vld [vmem:[%s3186_s15 + $0x50] sm:$0xff]  ;;  %v1383_v7 = vld [vmem:[%s3186_s15 + $0x78] sm:$0xff] }
 0x3ec   :  { %v1179_v41 = vmul.f32 %v1158_v14, %v1131_v30  ;;  %v1256_v14 = vld [vmem:[%s3185_s12 + $0x8] sm:$0xff] }
 0x3ee   :  { %v1227_v50 = vadd.f32 %v1206_v19, %v1179_v41  ;;  %v1350_v19 = vpop.permute.xlu0 %1349 }
 0x3f0   :  { %v1243_v61 = vmul.f32 0.2, %v1227_v50  ;;  %vm1235_vm4 = vcmp.ge.f32.partialorder %v1227_v50, 0.0 }
 0x3f1   :  { %v1118_v16 = vpop.f32.mrf.mxu3 }
 0x3f2   :  { %v1132_v26 = vadd.f32 %v1118_v16, %v1054_v23  ;;  %v1326_v16 = vpop.permute.xlu1 %1325 }
 0x3f4   :  { %v1180_v36 = vmul.f32 %v1163_v11, %v1132_v26  ;;  %v1248_v11 = vsel %vm1232_vm7, %v1224_v63, %v1240_v9  ;;  %v1381_v63 = vld [vmem:[%s3186_s15 + $0x68] sm:$0xff]  ;;  %v1386_v9 = vld [vmem:[%s3186_s15 + $0x90] sm:$0xff] }
 0x3f6   :  { %v1228_v47 = vadd.f32 %v1211_v15, %v1180_v36  ;;  %v1258_v15 = vld [vmem:[%s3185_s12 + $0x18] sm:$0xff]  ;;  %v1311_v26 = vpop.permute.xlu0 %1310 }
 0x3f8   :  { %v1244_v57 = vmul.f32 0.2, %v1228_v47  ;;  %vm1236_vm3 = vcmp.ge.f32.partialorder %v1228_v47, 0.0 }
 0x3f9   :  { %v1121_v20 = vpop.f32.mrf.mxu3 }
 0x3fa   :  { %v1133_v24 = vadd.f32 %v1121_v20, %v1057_v21  ;;  %v1252_v5 = vsel %vm1236_vm3, %v1228_v47, %v1244_v57  ;;  %v1316_v20 = vpop.permute.xlu1 %1315  ;;  %v1371_v47 = vld [vmem:[%s3186_s15 + $0x18] sm:$0xff]  ;;  %v1573_v57 = vld [vmem:[%s3187_s18 + $0x20] sm:$0xff] }
 0x3fc   :  { %v1181_v31 = vmul.f32 %v1168_v3, %v1133_v24  ;;  %v1249_v3 = vsel %vm1233_vm6, %v1225_v59, %v1241_v6  ;;  %v1571_v59 = vld [vmem:[%s3187_s18 + $0x10] sm:$0xff]  ;;  %v1385_v6 = vld [vmem:[%s3186_s15 + $0x88] sm:$0xff] }
 0x3fe   :  { %v1229_v42 = vadd.f32 %v1216_v13, %v1181_v31 }
 0x400   :  { %v1245_v52 = vmul.f32 0.2, %v1229_v42  ;;  %vm1237_vm2 = vcmp.ge.f32.partialorder %v1229_v42, 0.0 }
 0x401   :  { %v1124_v34 = vpop.f32.mrf.mxu3 }
 0x402   :  { %v1134_v37 = vadd.f32 %v1124_v34, %v1060_v29  ;;  %v1253_v60 = vsel %vm1237_vm2, %v1229_v42, %v1245_v52  ;;  %v1340_v31 = vpop.permute.xlu1 %1339  ;;  %v1335_v34 = vpop.permute.xlu2 %1334  ;;  %v1376_v52 = vld [vmem:[%s3186_s15 + $0x40] sm:$0xff] }
 0x404   :  { %v1182_v43 = vmul.f32 %v1173_v4, %v1134_v37  ;;  %v1251_v4 = vsel %vm1235_vm4, %v1227_v50, %v1243_v61  ;;  %v1374_v50 = vld [vmem:[%s3186_s15 + $0x30] sm:$0xff]  ;;  %v1569_v61 = vld [vmem:[%s3187_s18] sm:$0xff] }
 0x406   :  { %v1230_v48 = vadd.f32 %v1221_v10, %v1182_v43  ;;  %v1239_v10 = vmul.f32 0.2, %v1223_v0  ;;  %v1368_v43 = vld [vmem:[%s3186_s15] sm:$0xff] }
 0x408   :  { %vm1238_vm0 = vcmp.ge.f32.partialorder %v1230_v48, 0.0  ;;  %v1246_v51 = vmul.f32 0.2, %v1230_v48  ;;  %v1247_v13 = vsel %vm1231_vm8, %v1223_v0, %v1239_v10  ;;  %v1384_v0 = vld [vmem:[%s3186_s15 + $0x80] sm:$0xff]  ;;  %v1579_v10 = vld [vmem:[%s3187_s18 + $0x50] sm:$0xff] }
 0x40a   :  { %v1254_v56 = vsel %vm1238_vm0, %v1230_v48, %v1246_v51  ;;  %v1372_v48 = vld [vmem:[%s3186_s15 + $0x20] sm:$0xff]  ;;  %v1375_v51 = vld [vmem:[%s3186_s15 + $0x38] sm:$0xff] }
 0x40b   :  { %1287 = vmatpush.msra.mxu1 %v1254_v56  ;;  %2231 = vmatpush.msrb.mxu2 %v1254_v56  ;;  %v1574_v56 = vld [vmem:[%s3187_s18 + $0x28] sm:$0xff] }
 0x40c   :  { %1687 = vmatpush.msra.mxu3 %v1574_v56 }
 0x40d   :  { %1288 = vmatpush.msra.mxu1 %v1253_v60  ;;  %2232 = vmatpush.msrb.mxu2 %v1253_v60  ;;  %v1570_v60 = vld [vmem:[%s3187_s18 + $0x8] sm:$0xff] }
 0x40e   :  { %1688 = vmatpush.msra.mxu3 %v1573_v57 }
 0x40f   :  { %1289 = vmatpush.msra.mxu1 %v1252_v5  ;;  %2233 = vmatpush.msrb.mxu2 %v1252_v5  ;;  %v1382_v5 = vld [vmem:[%s3186_s15 + $0x70] sm:$0xff] }
 0x410   :  { %1689 = vmatpush.msra.mxu3 %v1572_v53 }
 0x411   :  { %1290 = vmatpush.msra.mxu1 %v1251_v4  ;;  %2234 = vmatpush.msrb.mxu2 %v1251_v4 }
 0x412   :  { %1690 = vmatpush.msra.mxu3 %v1571_v59 }
 0x413   :  { %1291 = vmatpush.msra.mxu1 %v1250_v2  ;;  %2235 = vmatpush.msrb.mxu2 %v1250_v2 }
 0x414   :  { %1691 = vmatpush.msra.mxu3 %v1570_v60 }
 0x415   :  { %1292 = vmatpush.msra.mxu1 %v1249_v3  ;;  %2236 = vmatpush.msrb.mxu2 %v1249_v3  ;;  %v1580_v3 = vld [vmem:[%s3187_s18 + $0x58] sm:$0xff] }
 0x416   :  { %1692 = vmatpush.msra.mxu3 %v1569_v61 }
 0x417   :  { %1293 = vmatpush.msra.mxu1 %v1248_v11  ;;  %2237 = vmatpush.msrb.mxu2 %v1248_v11 }
 0x419   :  { %1294 = vmatpush.msra.mxu1 %v1247_v13  ;;  %2238 = vmatpush.msrb.mxu2 %v1247_v13  ;;  %v1577_v13 = vld [vmem:[%s3187_s18 + $0x40] sm:$0xff] }
 0x41a   :  { %2172 = vmatmul.msk.f32.vlgmr.msra.gmra.mxu1 %vm616_vm10, %v1255_v1  ;;  %2174 = vmatmul.msk.f32.vlgmr.msrb.gmra.mxu2 %vm616_vm10, %v1257_v12  ;;  %v1387_v1 = vld [vmem:[%s3186_s15 + $0x98] sm:$0xff]  ;;  %v1578_v12 = vld [vmem:[%s3187_s18 + $0x48] sm:$0xff] }
 0x41b   :  { %1622 = vmatpush.msrb.mxu1 %v1580_v3 }
 0x41d   :  { %1623 = vmatpush.msrb.mxu1 %v1579_v10 }
 0x41f   :  { %1624 = vmatpush.msrb.mxu1 %v1578_v12 }
 0x421   :  { %1625 = vmatpush.msrb.mxu1 %v1577_v13 }
 0x422   :  { %2173 = vmatmul.msk.f32.gmra.mxu1 %vm616_vm10, %v1256_v14  ;;  %2175 = vmatmul.msk.f32.gmra.mxu2 %vm616_vm10, %v1258_v15  ;;  %v1576_v14 = vld [vmem:[%s3187_s18 + $0x38] sm:$0xff]  ;;  %v1575_v15 = vld [vmem:[%s3187_s18 + $0x30] sm:$0xff] }
 0x423   :  { %1626 = vmatpush.msrb.mxu1 %v1576_v14 }
 0x425   :  { %1627 = vmatpush.msrb.mxu1 %v1575_v15 }
 0x497   :  { %v1296_v18 = vpop.f32.mrf.mxu1 }
 0x498   :  { %v1328_v28 = vmul.f32 %v1311_v26, %v1296_v18 }
 0x49a   :  { %v1352_v35 = vadd.f32 %v1335_v34, %v1328_v28  ;;  %v1585_v28 = vld [vmem:[%s3187_s18 + $0x80] sm:$0xff] }
 0x49c   :  { %v1360_v41 = vmul.f32 0.2, %v1352_v35  ;;  %vm1356_vm13 = vcmp.ge.f32.partialorder %v1352_v35, 0.0 }
 0x49d   :  { %v1302_v21 = vpop.f32.mrf.mxu2 }
 0x49e   :  { %v1330_v24 = vmul.f32 %v1321_v17, %v1302_v21  ;;  %v1364_v44 = vsel %vm1356_vm13, %v1352_v35, %v1360_v41  ;;  %v1388_v17 = vld [vmem:[%s3186_s15 + $0xa0] sm:$0xff]  ;;  %v1390_v21 = vld [vmem:[%s3186_s15 + $0xb0] sm:$0xff] }
 0x49f   :  { %v1299_v23 = vpop.f32.mrf.mxu1 }
 0x4a0   :  { %v1329_v25 = vmul.f32 %v1316_v20, %v1299_v23  ;;  %v1354_v29 = vadd.f32 %v1345_v22, %v1330_v24  ;;  %v1391_v23 = vld [vmem:[%s3186_s15 + $0xb8] sm:$0xff] }
 0x4a2   :  { %v1353_v32 = vadd.f32 %v1340_v31, %v1329_v25  ;;  %v1362_v37 = vmul.f32 0.2, %v1354_v29  ;;  %vm1358_vm11 = vcmp.ge.f32.partialorder %v1354_v29, 0.0  ;;  %v1583_v31 = vld [vmem:[%s3187_s18 + $0x70] sm:$0xff] }
 0x4a4   :  { %v1361_v39 = vmul.f32 0.2, %v1353_v32  ;;  %vm1357_vm12 = vcmp.ge.f32.partialorder %v1353_v32, 0.0  ;;  %v1366_v40 = vsel %vm1358_vm11, %v1354_v29, %v1362_v37 }
 0x4a5   :  { %v1305_v27 = vpop.f32.mrf.mxu2 }
 0x4a6   :  { %v1331_v30 = vmul.f32 %v1326_v16, %v1305_v27  ;;  %v1365_v42 = vsel %vm1357_vm12, %v1353_v32, %v1361_v39  ;;  %v1586_v27 = vld [vmem:[%s3187_s18 + $0x88] sm:$0xff] }
 0x4a7   :  { %1752 = vmatpush.msra.mxu1 %v1586_v27  ;;  %v1582_v32 = vld [vmem:[%s3187_s18 + $0x68] sm:$0xff] }
 0x4a8   :  { %v1355_v33 = vadd.f32 %v1350_v19, %v1331_v30  ;;  %v1389_v19 = vld [vmem:[%s3186_s15 + $0xa8] sm:$0xff]  ;;  %v1584_v30 = vld [vmem:[%s3187_s18 + $0x78] sm:$0xff] }
 0x4a9   :  { %1753 = vmatpush.msra.mxu1 %v1585_v28 }
 0x4aa   :  { %vm1359_vm9 = vcmp.ge.f32.partialorder %v1355_v33, 0.0  ;;  %v1363_v36 = vmul.f32 0.2, %v1355_v33 }
 0x4ab   :  { %1754 = vmatpush.msra.mxu1 %v1584_v30 }
 0x4ac   :  { %v1367_v38 = vsel %vm1359_vm9, %v1355_v33, %v1363_v36  ;;  %v1581_v33 = vld [vmem:[%s3187_s18 + $0x60] sm:$0xff] }
 0x4ad   :  { %1492 = vmatpush.msrb.mxu0 %v1367_v38  ;;  %1755 = vmatpush.msra.mxu1 %v1583_v31 }
 0x4af   :  { %1493 = vmatpush.msrb.mxu0 %v1366_v40  ;;  %1756 = vmatpush.msra.mxu1 %v1582_v32 }
 0x4b1   :  { %1494 = vmatpush.msrb.mxu0 %v1365_v42  ;;  %1757 = vmatpush.msra.mxu1 %v1581_v33 }
 0x4b3   :  { %1495 = vmatpush.msrb.mxu0 %v1364_v44 }
 0x4b4   :  { %2176 = vmatmul.msk.f32.vlgmr.msrb.gmra.mxu0 %vm758_vm15, %v1368_v43 }
 0x4bc   :  { %2177 = vmatmul.msk.f32.gmra.mxu0 %vm758_vm15, %v1369_v45 }
 0x4c4   :  { %2178 = vmatmul.msk.f32.gmra.mxu0 %vm758_vm15, %v1370_v46 }
 0x4cc   :  { %2179 = vmatmul.msk.f32.gmra.mxu0 %vm758_vm15, %v1371_v47 }
 0x4d4   :  { %2180 = vmatmul.msk.f32.gmra.mxu0 %vm758_vm15, %v1372_v48 }
 0x4dc   :  { %2181 = vmatmul.msk.f32.gmra.mxu0 %vm758_vm15, %v1373_v49 }
 0x4e4   :  { %2182 = vmatmul.msk.f32.gmra.mxu0 %vm758_vm15, %v1374_v50 }
 0x4ec   :  { %2183 = vmatmul.msk.f32.gmra.mxu0 %vm758_vm15, %v1375_v51 }
 0x4f4   :  { %2184 = vmatmul.msk.f32.gmra.mxu0 %vm758_vm15, %v1376_v52 }
 0x4fc   :  { %2185 = vmatmul.msk.f32.gmra.mxu0 %vm758_vm15, %v1377_v54 }
 0x504   :  { %2186 = vmatmul.msk.f32.gmra.mxu0 %vm758_vm15, %v1378_v55 }
 0x50c   :  { %2187 = vmatmul.msk.f32.gmra.mxu0 %vm758_vm15, %v1379_v58 }
 0x514   :  { %2188 = vmatmul.msk.f32.gmra.mxu0 %vm758_vm15, %v1380_v62 }
 0x51c   :  { %2189 = vmatmul.msk.f32.gmra.mxu0 %vm758_vm15, %v1381_v63  ;;  %v1829_v63 = vpop.permute.xlu0 %1828 }
 0x524   :  { %2190 = vmatmul.msk.f32.gmra.mxu0 %vm758_vm15, %v1382_v5 }
 0x52c   :  { %2191 = vmatmul.msk.f32.gmra.mxu0 %vm758_vm15, %v1383_v7 }
 0x531   :  { %v1497_v8 = vpop.f32.mrf.mxu0 }
 0x532   :  { %2208 = vmatmul.msk.f32.vlgmr.msra.gmra.mxu3 %vm1587_vm14, %v1497_v8  ;;  %v1824_v8 = vpop.permute.xlu1 %1823 }
 0x534   :  { %2192 = vmatmul.msk.f32.gmra.mxu0 %vm758_vm15, %v1384_v0  ;;  %v1877_v0 = vpop.permute.xlu2 %1876 }
 0x539   :  { %v1500_v4 = vpop.f32.mrf.mxu0 }
 0x53a   :  { %2209 = vmatmul.msk.f32.gmra.mxu3 %vm1587_vm14, %v1500_v4  ;;  %v1819_v4 = vpop.permute.xlu0 %1818 }
 0x53c   :  { %2193 = vmatmul.msk.f32.gmra.mxu0 %vm758_vm15, %v1385_v6  ;;  %v1814_v3 = vpop.permute.xlu2 %1813 }
 0x541   :  { %v1503_v2 = vpop.f32.mrf.mxu0 }
 0x542   :  { %2210 = vmatmul.msk.f32.gmra.mxu3 %vm1587_vm14, %v1503_v2  ;;  %v1867_v10 = vpop.permute.xlu0 %1866 }
 0x544   :  { %2194 = vmatmul.msk.f32.gmra.mxu0 %vm758_vm15, %v1386_v9  ;;  %v1872_v9 = vpop.permute.xlu1 %1871  ;;  %v1862_v13 = vpop.permute.xlu2 %1861 }
 0x549   :  { %v1506_v11 = vpop.f32.mrf.mxu0 }
 0x54a   :  { %2211 = vmatmul.msk.f32.gmra.mxu3 %vm1587_vm14, %v1506_v11 }
 0x54c   :  { %2195 = vmatmul.msk.f32.gmra.mxu0 %vm758_vm15, %v1387_v1  ;;  %v1809_v12 = vpop.permute.xlu1 %1808  ;;  %v1799_v32 = vpop.permute.xlu2 %1798 }
 0x551   :  { %v1509_v16 = vpop.f32.mrf.mxu0 }
 0x552   :  { %2212 = vmatmul.msk.f32.gmra.mxu3 %vm1587_vm14, %v1509_v16  ;;  %v1804_v16 = vpop.permute.xlu0 %1803 }
 0x554   :  { %2196 = vmatmul.msk.f32.gmra.mxu0 %vm758_vm15, %v1388_v17 }
 0x559   :  { %v1512_v18 = vpop.f32.mrf.mxu0 }
 0x55a   :  { %2213 = vmatmul.msk.f32.gmra.mxu3 %vm1587_vm14, %v1512_v18 }
 0x55c   :  { %2197 = vmatmul.msk.f32.gmra.mxu0 %vm758_vm15, %v1389_v19 }
 0x561   :  { %v1515_v20 = vpop.f32.mrf.mxu0 }
 0x562   :  { %2214 = vmatmul.msk.f32.gmra.mxu3 %vm1587_vm14, %v1515_v20 }
 0x564   :  { %2198 = vmatmul.msk.f32.gmra.mxu0 %vm758_vm15, %v1390_v21 }
 0x569   :  { %v1518_v22 = vpop.f32.mrf.mxu0 }
 0x56a   :  { %2215 = vmatmul.msk.f32.gmra.mxu3 %vm1587_vm14, %v1518_v22 }
 0x56c   :  { %2199 = vmatmul.msk.f32.gmra.mxu0 %vm758_vm15, %v1391_v23 }
 0x571   :  { %v1521_v24 = vpop.f32.mrf.mxu0 }
 0x572   :  { %2200 = vmatmul.msk.f32.vlgmr.msrb.gmra.mxu1 %vm1587_vm14, %v1521_v24 }
 0x579   :  { %v1524_v25 = vpop.f32.mrf.mxu0 }
 0x57a   :  { %2201 = vmatmul.msk.f32.gmra.mxu1 %vm1587_vm14, %v1524_v25 }
 0x581   :  { %v1527_v26 = vpop.f32.mrf.mxu0 }
 0x582   :  { %2202 = vmatmul.msk.f32.gmra.mxu1 %vm1587_vm14, %v1527_v26  ;;  %v1857_v26 = vpop.permute.xlu1 %1856 }
 0x589   :  { %v1530_v29 = vpop.f32.mrf.mxu0 }
 0x58a   :  { %2203 = vmatmul.msk.f32.gmra.mxu1 %vm1587_vm14, %v1530_v29 }
 0x591   :  { %v1533_v34 = vpop.f32.mrf.mxu0 }
 0x592   :  { %2204 = vmatmul.msk.f32.gmra.mxu1 %vm1587_vm14, %v1533_v34 }
 0x599   :  { %v1536_v35 = vpop.f32.mrf.mxu0 }
 0x59a   :  { %2205 = vmatmul.msk.f32.gmra.mxu1 %vm1587_vm14, %v1536_v35 }
 0x5a1   :  { %v1539_v36 = vpop.f32.mrf.mxu0 }
 0x5a2   :  { %2206 = vmatmul.msk.f32.gmra.mxu1 %vm1587_vm14, %v1539_v36 }
 0x5a9   :  { %v1542_v37 = vpop.f32.mrf.mxu0 }
 0x5aa   :  { %2207 = vmatmul.msk.f32.gmra.mxu1 %vm1587_vm14, %v1542_v37 }
 0x5b1   :  { %v1545_v38 = vpop.f32.mrf.mxu0 }
 0x5b2   :  { %2216 = vmatmul.msk.f32.vlgmr.msra.gmra.mxu1 %vm1587_vm14, %v1545_v38  ;;  %v1852_v38 = vpop.permute.xlu0 %1851 }
 0x5b5   :  { %v1694_v47 = vpop.f32.mrf.mxu3 }
 0x5b9   :  { %v1548_v39 = vpop.f32.mrf.mxu0 }
 0x5ba   :  { %2217 = vmatmul.msk.f32.gmra.mxu1 %vm1587_vm14, %v1548_v39 }
 0x5bd   :  { %v1697_v57 = vpop.f32.mrf.mxu3 }
 0x5c1   :  { %v1551_v40 = vpop.f32.mrf.mxu0 }
 0x5c2   :  { %2218 = vmatmul.msk.f32.gmra.mxu1 %vm1587_vm14, %v1551_v40 }
 0x5c5   :  { %v1700_v59 = vpop.f32.mrf.mxu3 }
 0x5c9   :  { %v1554_v41 = vpop.f32.mrf.mxu0 }
 0x5ca   :  { %2219 = vmatmul.msk.f32.gmra.mxu1 %vm1587_vm14, %v1554_v41 }
 0x5cd   :  { %v1703_v61 = vpop.f32.mrf.mxu3 }
 0x5d1   :  { %v1557_v42 = vpop.f32.mrf.mxu0 }
 0x5d2   :  { %2220 = vmatmul.msk.f32.gmra.mxu1 %vm1587_vm14, %v1557_v42 }
 0x5d5   :  { %v1706_v7 = vpop.f32.mrf.mxu3 }
 0x5d9   :  { %v1560_v43 = vpop.f32.mrf.mxu0 }
 0x5da   :  { %2221 = vmatmul.msk.f32.gmra.mxu1 %vm1587_vm14, %v1560_v43 }
 0x5dd   :  { %v1709_v2 = vpop.f32.mrf.mxu3 }
 0x5e1   :  { %v1563_v44 = vpop.f32.mrf.mxu0 }
 0x5e2   :  { %2222 = vmatmul.msk.f32.gmra.mxu1 %vm1587_vm14, %v1563_v44 }
 0x5e5   :  { %v1712_v1 = vpop.f32.mrf.mxu3 }
 0x5e9   :  { %v1566_v45 = vpop.f32.mrf.mxu0 }
 0x5ea   :  { %2223 = vmatmul.msk.f32.gmra.mxu1 %vm1587_vm14, %v1566_v45 }
 0x5ed   :  { %v1715_v21 = vpop.f32.mrf.mxu3 }
 0x5ef   :  { %v1629_v46 = vpop.f32.mrf.mxu1 }
 0x5f0   :  { %v1695_v48 = vadd.f32 %v1694_v47, %v1629_v46 }
 0x5f7   :  { %v1632_v49 = vpop.f32.mrf.mxu1 }
 0x5f8   :  { %v1698_v34 = vadd.f32 %v1697_v57, %v1632_v49  ;;  %v1847_v57 = vpop.permute.xlu2 %1846 }
 0x5ff   :  { %v1635_v50 = vpop.f32.mrf.mxu1 }
 0x600   :  { %v1701_v27 = vadd.f32 %v1700_v59, %v1635_v50 }
 0x607   :  { %v1638_v51 = vpop.f32.mrf.mxu1 }
 0x608   :  { %v1704_v22 = vadd.f32 %v1703_v61, %v1638_v51  ;;  %v1842_v61 = vpop.permute.xlu0 %1841 }
 0x60f   :  { %v1641_v52 = vpop.f32.mrf.mxu1 }
 0x610   :  { %v1707_v19 = vadd.f32 %v1706_v7, %v1641_v52  ;;  %v1794_v52 = vpop.permute.xlu1 %1793 }
 0x617   :  { %v1644_v54 = vpop.f32.mrf.mxu1 }
 0x618   :  { %v1710_v17 = vadd.f32 %v1709_v2, %v1644_v54 }
 0x61f   :  { %v1647_v55 = vpop.f32.mrf.mxu1 }
 0x620   :  { %v1713_v15 = vadd.f32 %v1712_v1, %v1647_v55  ;;  %v1967_v1 = vpop.permute.xlu1 %1966 }
 0x627   :  { %v1650_v56 = vpop.f32.mrf.mxu1 }
 0x628   :  { %v1716_v25 = vadd.f32 %v1715_v21, %v1650_v56 }
 0x62f   :  { %v1759_v58 = vpop.f32.mrf.mxu1 }
 0x630   :  { %v1783_v53 = vadd.f32 %v1759_v58, %v1695_v48 }
 0x632   :  { %v1831_v49 = vmul.f32 %v1794_v52, %v1783_v53 }
 0x637   :  { %v1762_v60 = vpop.f32.mrf.mxu1 }
 0x638   :  { %v1784_v39 = vadd.f32 %v1762_v60, %v1698_v34 }
 0x63a   :  { %v1832_v47 = vmul.f32 %v1799_v32, %v1784_v39 }
 0x63c   :  { %v1880_v58 = vadd.f32 %v1847_v57, %v1832_v47 }
 0x63e   :  { %vm1888_vm6 = vcmp.ge.f32.partialorder %v1880_v58, 0.0 }
 0x63f   :  { %v1765_v62 = vpop.f32.mrf.mxu1 }
 0x640   :  { %v1785_v33 = vadd.f32 %v1765_v62, %v1701_v27  ;;  %v1879_v62 = vadd.f32 %v1842_v61, %v1831_v49 }
 0x642   :  { %v1833_v43 = vmul.f32 %v1804_v16, %v1785_v33  ;;  %vm1887_vm7 = vcmp.ge.f32.partialorder %v1879_v62, 0.0 }
 0x644   :  { %v1881_v54 = vadd.f32 %v1852_v38, %v1833_v43 }
 0x646   :  { %vm1889_vm5 = vcmp.ge.f32.partialorder %v1881_v54, 0.0 }
 0x647   :  { %v1768_v5 = vpop.f32.mrf.mxu1 }
 0x648   :  { %v1786_v29 = vadd.f32 %v1768_v5, %v1704_v22  ;;  %v1897_v5 = vmul.f32 0.2, %v1881_v54 }
 0x64a   :  { %v1834_v40 = vmul.f32 %v1809_v12, %v1786_v29  ;;  %v1905_v53 = vsel %vm1889_vm5, %v1881_v54, %v1897_v5  ;;  %v1977_v12 = vpop.permute.xlu0 %1976 }
 0x64c   :  { %v1882_v48 = vadd.f32 %v1857_v26, %v1834_v40 }
 0x64e   :  { %v1898_v60 = vmul.f32 0.2, %v1882_v48  ;;  %vm1890_vm4 = vcmp.ge.f32.partialorder %v1882_v48, 0.0 }
 0x64f   :  { %v1771_v6 = vpop.f32.mrf.mxu1 }
 0x650   :  { %v1787_v23 = vadd.f32 %v1771_v6, %v1707_v19  ;;  %v1906_v7 = vsel %vm1890_vm4, %v1882_v48, %v1898_v60  ;;  %v1911_v6 = vld [vmem:[%s3188_s19] sm:$0xff] }
 0x652   :  { %v1835_v35 = vmul.f32 %v1814_v3, %v1787_v23  ;;  %v1913_v3 = vld [vmem:[%s3188_s19 + $0x10] sm:$0xff] }
 0x654   :  { %v1883_v44 = vadd.f32 %v1862_v13, %v1835_v35 }
 0x656   :  { %v1899_v56 = vmul.f32 0.2, %v1883_v44  ;;  %vm1891_vm3 = vcmp.ge.f32.partialorder %v1883_v44, 0.0 }
 0x657   :  { %v1774_v11 = vpop.f32.mrf.mxu1 }
 0x658   :  { %v1788_v20 = vadd.f32 %v1774_v11, %v1710_v17  ;;  %v1972_v11 = vpop.permute.xlu2 %1971  ;;  %v1982_v17 = vpop.permute.xlu1 %1981 }
 0x65a   :  { %v1836_v30 = vmul.f32 %v1819_v4, %v1788_v20  ;;  %v1996_v20 = vpop.permute.xlu0 %1995 }
 0x65c   :  { %v1884_v41 = vadd.f32 %v1867_v10, %v1836_v30  ;;  %v1914_v10 = vld [vmem:[%s3188_s19 + $0x18] sm:$0xff] }
 0x65e   :  { %v1900_v51 = vmul.f32 0.2, %v1884_v41  ;;  %vm1892_vm2 = vcmp.ge.f32.partialorder %v1884_v41, 0.0 }
 0x65f   :  { %v1777_v14 = vpop.f32.mrf.mxu1 }
 0x660   :  { %v1789_v18 = vadd.f32 %v1777_v14, %v1713_v15  ;;  %v1908_v59 = vsel %vm1892_vm2, %v1884_v41, %v1900_v51  ;;  %v1991_v15 = vpop.permute.xlu2 %1990 }
 0x662   :  { %v1837_v24 = vmul.f32 %v1824_v8, %v1789_v18  ;;  %v1896_v8 = vmul.f32 0.2, %v1880_v58 }
 0x664   :  { %v1885_v36 = vadd.f32 %v1872_v9, %v1837_v24  ;;  %v1904_v4 = vsel %vm1888_vm6, %v1880_v58, %v1896_v8  ;;  %v1912_v9 = vld [vmem:[%s3188_s19 + $0x8] sm:$0xff]  ;;  %v2001_v24 = vpop.permute.xlu1 %2000 }
 0x666   :  { %v1901_v46 = vmul.f32 0.2, %v1885_v36  ;;  %vm1893_vm0 = vcmp.ge.f32.partialorder %v1885_v36, 0.0 }
 0x667   :  { %v1780_v28 = vpop.f32.mrf.mxu1 }
 0x668   :  { %v1790_v31 = vadd.f32 %v1780_v28, %v1716_v25  ;;  %v1909_v55 = vsel %vm1893_vm0, %v1885_v36, %v1901_v46  ;;  %v2006_v28 = vpop.permute.xlu2 %2005 }
 0x66a   :  { %v1838_v37 = vmul.f32 %v1829_v63, %v1790_v31  ;;  %v1907_v63 = vsel %vm1891_vm3, %v1883_v44, %v1899_v56 }
 0x66c   :  { %v1886_v42 = vadd.f32 %v1877_v0, %v1838_v37  ;;  %v1895_v0 = vmul.f32 0.2, %v1879_v62 }
 0x66e   :  { %vm1894_vm15 = vcmp.ge.f32.partialorder %v1886_v42, 0.0  ;;  %v1902_v45 = vmul.f32 0.2, %v1886_v42  ;;  %v1903_v2 = vsel %vm1887_vm7, %v1879_v62, %v1895_v0 }
 0x670   :  { %v1910_v50 = vsel %vm1894_vm15, %v1886_v42, %v1902_v45 }
 0x671   :  { %1943 = vmatpush.msra.mxu2 %v1910_v50 }
 0x673   :  { %1944 = vmatpush.msra.mxu2 %v1909_v55 }
 0x675   :  { %1945 = vmatpush.msra.mxu2 %v1908_v59 }
 0x677   :  { %1946 = vmatpush.msra.mxu2 %v1907_v63 }
 0x679   :  { %1947 = vmatpush.msra.mxu2 %v1906_v7 }
 0x67b   :  { %1948 = vmatpush.msra.mxu2 %v1905_v53 }
 0x67d   :  { %1949 = vmatpush.msra.mxu2 %v1904_v4 }
 0x67f   :  { %1950 = vmatpush.msra.mxu2 %v1903_v2 }
 0x680   :  { %2224 = vmatmul.msk.f32.vlgmr.msra.gmra.mxu2 %vm616_vm10, %v1911_v6 }
 0x688   :  { %2225 = vmatmul.msk.f32.gmra.mxu2 %vm616_vm10, %v1912_v9 }
 0x690   :  { %2226 = vmatmul.msk.f32.gmra.mxu2 %vm616_vm10, %v1913_v3 }
 0x698   :  { %2227 = vmatmul.msk.f32.gmra.mxu2 %vm616_vm10, %v1914_v10 }
 0x703   :  { %v1952_v13 = vpop.f32.mrf.mxu2 }
 0x704   :  { %v1984_v14 = vmul.f32 %v1967_v1, %v1952_v13 }
 0x706   :  { %v2008_v16 = vadd.f32 %v1991_v15, %v1984_v14 }
 0x708   :  { %2052 = vst.msk [vmem:[%s3189_s22] sm:$0xff] %vm280_vm1, %v2008_v16  ;;  %2040 = vrot.lane.b32.xlu2 %v2008_v16, %s2247_s20  ;;  %2028 = vrot.lane.b32.xlu1 %v2008_v16, %s2248_s21 }
 0x709   :  { %2016 = vrot.lane.b32.xlu0 %v2008_v16, %s2249_s8 }
 0x70b   :  { %v1955_v18 = vpop.f32.mrf.mxu2 }
 0x70c   :  { %v1985_v19 = vmul.f32 %v1972_v11, %v1955_v18 }
 0x70e   :  { %v2009_v21 = vadd.f32 %v1996_v20, %v1985_v19 }
 0x710   :  { %2053 = vst.msk [vmem:[%s3189_s22 + $0x8] sm:$0xff] %vm280_vm1, %v2009_v21  ;;  %2030 = vrot.lane.b32.xlu2 %v2009_v21, %s2248_s21  ;;  %2018 = vrot.lane.b32.xlu1 %v2009_v21, %s2249_s8 }
 0x713   :  { %v1958_v22 = vpop.f32.mrf.mxu2 }
 0x714   :  { %v1986_v23 = vmul.f32 %v1977_v12, %v1958_v22 }
 0x716   :  { %v2010_v25 = vadd.f32 %v2001_v24, %v1986_v23 }
 0x718   :  { %2054 = vst.msk [vmem:[%s3189_s22 + $0x10] sm:$0xff] %vm280_vm1, %v2010_v25  ;;  %2032 = vrot.lane.b32.xlu0 %v2010_v25, %s2248_s21  ;;  %2020 = vrot.lane.b32.xlu2 %v2010_v25, %s2249_s8 }
 0x71b   :  { %v1961_v26 = vpop.f32.mrf.mxu2 }
 0x71c   :  { %v1987_v27 = vmul.f32 %v1982_v17, %v1961_v26 }
 0x71e   :  { %v2011_v29 = vadd.f32 %v2006_v28, %v1987_v27 }
 0x720   :  { %2055 = vst.msk [vmem:[%s3189_s22 + $0x18] sm:$0xff] %vm280_vm1, %v2011_v29  ;;  %2046 = vrot.lane.b32.xlu2 %v2011_v29, %s2247_s20  ;;  %2034 = vrot.lane.b32.xlu1 %v2011_v29, %s2248_s21 }
 0x721   :  { %2022 = vrot.lane.b32.xlu0 %v2011_v29, %s2249_s8 }
 0x728   :  { %2044 = vrot.lane.b32.xlu1 %v2010_v25, %s2247_s20 }
 0x729   :  { %2042 = vrot.lane.b32.xlu0 %v2009_v21, %s2247_s20 }
 0x762   :  { %v2041_v30 = vpop.permute.xlu2 %2040 }
 0x763   :  { %2064 = vst.msk [vmem:[%s3189_s22 + $0x60] sm:$0xff] %vm280_vm1, %v2041_v30 }
 0x76a   :  { %v2031_v31 = vpop.permute.xlu2 %2030 }
 0x76b   :  { %2061 = vst.msk [vmem:[%s3189_s22 + $0x48] sm:$0xff] %vm280_vm1, %v2031_v31 }
 0x772   :  { %v2021_v32 = vpop.permute.xlu2 %2020 }
 0x773   :  { %2058 = vst.msk [vmem:[%s3189_s22 + $0x30] sm:$0xff] %vm280_vm1, %v2021_v32 }
 0x77a   :  { %v2029_v33 = vpop.permute.xlu1 %2028  ;;  %v2047_v34 = vpop.permute.xlu2 %2046 }
 0x77b   :  { %2060 = vst.msk [vmem:[%s3189_s22 + $0x40] sm:$0xff] %vm280_vm1, %v2029_v33  ;;  %v2017_v35 = vpop.permute.xlu0 %2016 }
 0x77c   :  { %2056 = vst.msk [vmem:[%s3189_s22 + $0x20] sm:$0xff] %vm280_vm1, %v2017_v35 }
 0x77d   :  { %2067 = vst.msk [vmem:[%s3189_s22 + $0x78] sm:$0xff] %vm280_vm1, %v2047_v34 }
 0x782   :  { %v2019_v36 = vpop.permute.xlu1 %2018 }
 0x783   :  { %2057 = vst.msk [vmem:[%s3189_s22 + $0x28] sm:$0xff] %vm280_vm1, %v2019_v36 }
 0x78a   :  { %v2033_v37 = vpop.permute.xlu0 %2032 }
 0x78b   :  { %2062 = vst.msk [vmem:[%s3189_s22 + $0x50] sm:$0xff] %vm280_vm1, %v2033_v37 }
 0x792   :  { %v2035_v38 = vpop.permute.xlu1 %2034 }
 0x793   :  { %2063 = vst.msk [vmem:[%s3189_s22 + $0x58] sm:$0xff] %vm280_vm1, %v2035_v38  ;;  %v2023_v39 = vpop.permute.xlu0 %2022 }
 0x794   :  { %2059 = vst.msk [vmem:[%s3189_s22 + $0x38] sm:$0xff] %vm280_vm1, %v2023_v39 }
 0x79a   :  { %v2045_v40 = vpop.permute.xlu1 %2044 }
 0x79b   :  { %2066 = vst.msk [vmem:[%s3189_s22 + $0x70] sm:$0xff] %vm280_vm1, %v2045_v40  ;;  %v2043_v41 = vpop.permute.xlu0 %2042 }
 0x79c   :  { %2065 = vst.msk [vmem:[%s3189_s22 + $0x68] sm:$0xff] %vm280_vm1, %v2043_v41 }

</bundles_post_ra>
